<compile_context>
chip_gen: v5e
topology: v5e:2x2
jax: 0.10.0
libtpu: 0.0.40
codegen_flags: <defaults>
</compile_context>

<pallas_src>
import functools
import math

import jax
import jax.numpy as jnp
from jax.experimental import pallas as pl
from jax.experimental.pallas import tpu as pltpu


# ----------------------------------------------------------------------------
# Fused TransformerBlock kernel: one grid step == one sequence chunk, all batches
# ----------------------------------------------------------------------------
def _block_kernel(num_heads, x_ref, wqkv_ref, bqkv_ref, wo_ref, bo_ref,
                  fc1_ref, fc2_ref, o_ref):
    B, _, Sc, D = x_ref.shape
    nH = num_heads
    dh = D // nH
    BH = B * nH

    x = x_ref[:, 0].astype(jnp.float32)                            # (B, Sc, D)

    # ---- multi-head self-attention on this chunk ---------------------------
    # Tokens broadcast over heads, per-head weights broadcast over batch, so every
    # matmul is a single (B*nH)-batched einsum (no per-head loop, no concatenate).
    xh = jnp.broadcast_to(x[:, None], (B, nH, Sc, D)).reshape(BH, Sc, D)
    wqkv = jnp.broadcast_to(wqkv_ref[...][None],
                            (B, nH, D, 3 * dh)).reshape(BH, D, 3 * dh)
    bqkv = jnp.broadcast_to(bqkv_ref[...][None],
                            (B, nH, 1, 3 * dh)).reshape(BH, 1, 3 * dh)
    wo = jnp.broadcast_to(wo_ref[...][None],
                          (B, nH, dh, D)).reshape(BH, dh, D)

    # Fused QKV projection (1/sqrt(dh) is pre-folded into the Q weights/bias).
    qkv = jnp.einsum('bsd,bde->bse', xh, wqkv,
                     preferred_element_type=jnp.float32) + bqkv    # (BH, Sc, 3*dh)
    q = qkv[:, :, :dh]
    k = qkv[:, :, dh:2 * dh]
    v = qkv[:, :, 2 * dh:]

    # Scores + numerically-stable softmax (f32; reciprocal on the EUP).
    s = jnp.einsum('bqe,bke->bqk', q, k, preferred_element_type=jnp.float32)
    s = s - jnp.max(s, axis=-1, keepdims=True)
    p = jnp.exp(s)
    p = p * pl.reciprocal(jnp.sum(p, axis=-1, keepdims=True), approx=True)

    ctx = jnp.einsum('bqk,bke->bqe', p, v,
                     preferred_element_type=jnp.float32)           # (BH, Sc, dh)

    # Per-head slice of the output projection; summing over heads == concat(heads) @ Wo.
    out_h = jnp.einsum('bqe,bed->bqd', ctx, wo,
                       preferred_element_type=jnp.float32)         # (BH, Sc, D)
    attn = jnp.sum(out_h.reshape(B, nH, Sc, D), axis=1) + bo_ref[...]   # (B, Sc, D)

    # all_to_all (CommOperation) is the identity at world_size == 1.
    # TODO(synk): a real multi-chip all_to_all needs pltpu.make_async_remote_copy + semaphores.

    # ---- expert FFN: batch index == expert index (torch.matmul broadcast contract) ----
    h = jnp.einsum('bsd,bdh->bsh', attn, fc1_ref[...],
                   preferred_element_type=jnp.float32)
    h = jnp.maximum(h, 0.0)                                        # ReLU
    y = jnp.einsum('bsh,bhd->bsd', h, fc2_ref[...],
                   preferred_element_type=jnp.float32)

    o_ref[...] = y[:, None].astype(o_ref.dtype)                    # (B, 1, Sc, D)


def _full_spec(shape):
    n = len(shape)
    return pl.BlockSpec(shape, lambda i: (0,) * n)


def transformer_block_pallas(x, p, num_heads, a2a_ffn_overlap_degree):
    B, S, D = x.shape
    E, _, H = p["fc1"].shape
    assert B == E, "torch.matmul broadcast contract requires batch == num_experts"
    assert S % a2a_ffn_overlap_degree == 0
    assert D % num_heads == 0
    Sc = S // a2a_ffn_overlap_degree
    dh = D // num_heads
    nH = num_heads

    # Chunk the sequence exactly like TransformerBlock._split_input, but keep all
    # chunks in one array so the whole block is a single pallas_call whose grid axis
    # iterates over chunks ("parallel": shards across TensorCores where available).
    xc = x.reshape(B, a2a_ffn_overlap_degree, Sc, D)

    out = pl.pallas_call(
        functools.partial(_block_kernel, num_heads),
        out_shape=jax.ShapeDtypeStruct((B, a2a_ffn_overlap_degree, Sc, D), x.dtype),
        grid=(a2a_ffn_overlap_degree,),
        in_specs=[
            pl.BlockSpec((B, 1, Sc, D), lambda i: (0, i, 0, 0)),
            _full_spec((nH, D, 3 * dh)),     # fused per-head QKV weights
            _full_spec((nH, 1, 3 * dh)),     # fused per-head QKV biases
            _full_spec((nH, dh, D)),         # per-head output-projection weights
            _full_spec((1, D)),              # output-projection bias
            _full_spec((E, D, H)),           # expert fc1
            _full_spec((E, H, D)),           # expert fc2
        ],
        out_specs=pl.BlockSpec((B, 1, Sc, D), lambda i: (0, i, 0, 0)),
        compiler_params=pltpu.CompilerParams(
            dimension_semantics=("parallel",)),
    )(xc, p["wqkv_h"], p["bqkv_h"], p["wo_h"], p["bo"], p["fc1"], p["fc2"])
    return out.reshape(B, S, D)


@functools.partial(jax.jit, static_argnames=("num_heads", "a2a_ffn_overlap_degree"))
def simple_transformer_moe_forward(x, prepped_params, *, num_heads, a2a_ffn_overlap_degree):
    for p in prepped_params:
        x = transformer_block_pallas(x, p, num_heads, a2a_ffn_overlap_degree)
    return x


# ----------------------------------------------------------------------------
# Parameters: raw (PyTorch-like) layout + kernel-friendly prepared layout
# ----------------------------------------------------------------------------
def init_params(key, model_dim, num_layers, hidden_size, num_experts):
    params = []
    for _ in range(num_layers):
        key, *ks = jax.random.split(key, 11)
        layer = {
            # attention projections, stored pre-transposed (used as x @ W)
            "wq": 0.1 * jax.random.normal(ks[0], (model_dim, model_dim), jnp.float32),
            "wk": 0.1 * jax.random.normal(ks[1], (model_dim, model_dim), jnp.float32),
            "wv": 0.1 * jax.random.normal(ks[2], (model_dim, model_dim), jnp.float32),
            "wo": 0.1 * jax.random.normal(ks[3], (model_dim, model_dim), jnp.float32),
            "bq": 0.1 * jax.random.normal(ks[4], (1, model_dim), jnp.float32),
            "bk": 0.1 * jax.random.normal(ks[5], (1, model_dim), jnp.float32),
            "bv": 0.1 * jax.random.normal(ks[6], (1, model_dim), jnp.float32),
            "bo": 0.1 * jax.random.normal(ks[7], (1, model_dim), jnp.float32),
            # expert weights (torch.randn equivalents, mildly scaled for stability)
            "fc1": 0.1 * jax.random.normal(ks[8], (num_experts, model_dim, hidden_size),
                                           jnp.float32),
            "fc2": 0.1 * jax.random.normal(ks[9], (num_experts, hidden_size, model_dim),
                                           jnp.float32),
        }
        params.append(layer)
    return params


def prep_layer_params(p, num_heads):
    """Fold the 1/sqrt(dh) scale into Wq/bq and split Q/K/V/Wo per head (plain JAX)."""
    D = p["wq"].shape[0]
    dh = D // num_heads
    scale = 1.0 / math.sqrt(dh)

    def per_head_in(w):                       # (D, D) used as x @ w -> (nH, D, dh)
        return w.reshape(D, num_heads, dh).transpose(1, 0, 2)

    wq_h = per_head_in(p["wq"]) * scale
    wk_h = per_head_in(p["wk"])
    wv_h = per_head_in(p["wv"])
    bq_h = p["bq"].reshape(num_heads, 1, dh) * scale
    bk_h = p["bk"].reshape(num_heads, 1, dh)
    bv_h = p["bv"].reshape(num_heads, 1, dh)

    return {
        "wqkv_h": jnp.concatenate([wq_h, wk_h, wv_h], axis=-1),    # (nH, D, 3*dh)
        "bqkv_h": jnp.concatenate([bq_h, bk_h, bv_h], axis=-1),    # (nH, 1, 3*dh)
        "wo_h": p["wo"].reshape(num_heads, dh, D),                 # (nH, dh, D)
        "bo": p["bo"],                                             # (1, D)
        "fc1": p["fc1"],
        "fc2": p["fc2"],
    }


# ----------------------------------------------------------------------------
# Pure-JAX reference (mirrors the PyTorch forward) for a correctness smoke test
# ----------------------------------------------------------------------------
def reference_forward(x, raw_params, num_heads, a2a_ffn_overlap_degree):
    for p in raw_params:
        B, S, D = x.shape
        Sc = S // a2a_ffn_overlap_degree
        dh = D // num_heads
        scale = 1.0 / math.sqrt(dh)
        outs = []
        for i in range(a2a_ffn_overlap_degree):
            c = x[:, i * Sc:(i + 1) * Sc, :]
            q = c @ p["wq"] + p["bq"]
            k = c @ p["wk"] + p["bk"]
            v = c @ p["wv"] + p["bv"]

            def split(t):
                return t.reshape(B, Sc, num_heads, dh).transpose(0, 2, 1, 3)

            qh, kh, vh = split(q), split(k), split(v)
            s = jnp.einsum("bhqe,bhke->bhqk", qh, kh) * scale
            a = jax.nn.softmax(s, axis=-1)
            ctx = jnp.einsum("bhqk,bhke->bhqe", a, vh)
            ctx = ctx.transpose(0, 2, 1, 3).reshape(B, Sc, D)
            attn = ctx @ p["wo"] + p["bo"]
            h = jax.nn.relu(jnp.einsum("bsd,bdh->bsh", attn, p["fc1"]))
            outs.append(jnp.einsum("bsh,bhd->bsd", h, p["fc2"]))
        x = jnp.concatenate(outs, axis=1)
    return x


if __name__ == "__main__":
    # Hyper-parameters (small shapes consistent with the module).
    model_dim = 32
    num_layers = 2
    num_heads = 4
    hidden_size = 64
    num_local_experts = 2
    dist_world_size = 1                       # single device: all_to_all is the identity
    num_experts = num_local_experts * dist_world_size   # = 2
    batch = num_experts                       # required by the matmul broadcast contract
    seq = 8
    a2a_ffn_overlap_degree = 2

    key = jax.random.PRNGKey(0)
    key, xkey = jax.random.split(key)
    x = jax.random.normal(xkey, (batch, seq, model_dim), jnp.float32)
    raw_params = init_params(key, model_dim, num_layers, hidden_size, num_experts)
    prepped = [prep_layer_params(p, num_heads) for p in raw_params]

    out = simple_transformer_moe_forward(
        x, prepped, num_heads=num_heads,
        a2a_ffn_overlap_degree=a2a_ffn_overlap_degree)
    out = jax.block_until_ready(out)

    ref = reference_forward(x, raw_params, num_heads, a2a_ffn_overlap_degree)
    assert out.shape == (batch, seq, model_dim)
    assert bool(jnp.all(jnp.isfinite(out)))
    err = float(jnp.max(jnp.abs(out - ref)))
    assert err < 5e-2, f"kernel/reference mismatch: max abs err {err}"
    print("KERNEL_OK")
</pallas_src>

<mosaic_0001>
module attributes {stable_mosaic.version = 11 : i64} {
  func.func @_block_kernel(%arg0: i32, %arg1: memref<2x1x4x32xf32, #tpu.memory_space<vmem>>, %arg2: memref<4x32x24xf32, #tpu.memory_space<vmem>>, %arg3: memref<4x1x24xf32, #tpu.memory_space<vmem>>, %arg4: memref<4x8x32xf32, #tpu.memory_space<vmem>>, %arg5: memref<1x32xf32, #tpu.memory_space<vmem>>, %arg6: memref<2x32x64xf32, #tpu.memory_space<vmem>>, %arg7: memref<2x64x32xf32, #tpu.memory_space<vmem>>, %arg8: memref<2x1x4x32xf32, #tpu.memory_space<vmem>>) attributes {dimension_semantics = [#tpu.dimension_semantics<parallel>], iteration_bounds = array<i64: 2>, scalar_prefetch = 0 : i64, scratch_operands = 0 : i64, tpu.core_type = #tpu.core_type<tc>, window_params = [{transform_indices = @transform_0, window_bounds = array<i64: 2, 1, 4, 32>}, {pipeline_mode = #tpu.pipeline_mode<synchronous>, transform_indices = @transform_1, window_bounds = array<i64: 4, 32, 24>}, {pipeline_mode = #tpu.pipeline_mode<synchronous>, transform_indices = @transform_2, window_bounds = array<i64: 4, 1, 24>}, {pipeline_mode = #tpu.pipeline_mode<synchronous>, transform_indices = @transform_3, window_bounds = array<i64: 4, 8, 32>}, {pipeline_mode = #tpu.pipeline_mode<synchronous>, transform_indices = @transform_4, window_bounds = array<i64: 1, 32>}, {pipeline_mode = #tpu.pipeline_mode<synchronous>, transform_indices = @transform_5, window_bounds = array<i64: 2, 32, 64>}, {pipeline_mode = #tpu.pipeline_mode<synchronous>, transform_indices = @transform_6, window_bounds = array<i64: 2, 64, 32>}, {transform_indices = @transform_7, window_bounds = array<i64: 2, 1, 4, 32>}]} {
    %c0 = arith.constant 0 : index
    %c0_0 = arith.constant 0 : index
    %c0_1 = arith.constant 0 : index
    %c0_2 = arith.constant 0 : index
    %0 = vector.load %arg1[%c0, %c0_0, %c0_1, %c0_2] : memref<2x1x4x32xf32, #tpu.memory_space<vmem>>, vector<2x1x4x32xf32>
    %1 = vector.shape_cast %0 : vector<2x1x4x32xf32> to vector<2x4x32xf32>
    %2 = vector.shape_cast %1 : vector<2x4x32xf32> to vector<2x1x4x32xf32>
    %3 = vector.shape_cast %2 : vector<2x1x4x32xf32> to vector<2x1x4x32xf32>
    %4 = vector.broadcast %3 : vector<2x1x4x32xf32> to vector<2x4x4x32xf32>
    %5 = vector.shape_cast %4 : vector<2x4x4x32xf32> to vector<8x4x32xf32>
    %c0_3 = arith.constant 0 : index
    %c0_4 = arith.constant 0 : index
    %c0_5 = arith.constant 0 : index
    %6 = vector.load %arg2[%c0_3, %c0_4, %c0_5] : memref<4x32x24xf32, #tpu.memory_space<vmem>>, vector<4x32x24xf32>
    %7 = vector.shape_cast %6 : vector<4x32x24xf32> to vector<1x4x32x24xf32>
    %8 = vector.shape_cast %7 : vector<1x4x32x24xf32> to vector<1x4x32x24xf32>
    %9 = vector.broadcast %8 : vector<1x4x32x24xf32> to vector<2x4x32x24xf32>
    %10 = vector.shape_cast %9 : vector<2x4x32x24xf32> to vector<8x32x24xf32>
    %c0_6 = arith.constant 0 : index
    %c0_7 = arith.constant 0 : index
    %c0_8 = arith.constant 0 : index
    %11 = vector.load %arg3[%c0_6, %c0_7, %c0_8] : memref<4x1x24xf32, #tpu.memory_space<vmem>>, vector<4x1x24xf32>
    %12 = vector.shape_cast %11 : vector<4x1x24xf32> to vector<1x4x1x24xf32>
    %13 = vector.shape_cast %12 : vector<1x4x1x24xf32> to vector<1x4x1x24xf32>
    %14 = vector.broadcast %13 : vector<1x4x1x24xf32> to vector<2x4x1x24xf32>
    %15 = vector.shape_cast %14 : vector<2x4x1x24xf32> to vector<8x1x24xf32>
    %c0_9 = arith.constant 0 : index
    %c0_10 = arith.constant 0 : index
    %c0_11 = arith.constant 0 : index
    %16 = vector.load %arg4[%c0_9, %c0_10, %c0_11] : memref<4x8x32xf32, #tpu.memory_space<vmem>>, vector<4x8x32xf32>
    %17 = vector.shape_cast %16 : vector<4x8x32xf32> to vector<1x4x8x32xf32>
    %18 = vector.shape_cast %17 : vector<1x4x8x32xf32> to vector<1x4x8x32xf32>
    %19 = vector.broadcast %18 : vector<1x4x8x32xf32> to vector<2x4x8x32xf32>
    %20 = vector.shape_cast %19 : vector<2x4x8x32xf32> to vector<8x8x32xf32>
    "tpu.trace_start"() <{level = 10 : i32, message = "bsd,bde->bse"}> : () -> ()
    %cst = arith.constant dense<0.000000e+00> : vector<8x4x24xf32>
    %21 = tpu.matmul %5, %10, %cst {dimension_numbers = #tpu.dot_dimension_numbers<[2], [1], [1], [2], [0, 0, 0, 1, 1, 2], [0], [0]>} : vector<8x4x32xf32>, vector<8x32x24xf32>, vector<8x4x24xf32> -> vector<8x4x24xf32>
    "tpu.trace_stop"() : () -> ()
    %22 = vector.broadcast %15 : vector<8x1x24xf32> to vector<8x4x24xf32>
    %23 = arith.addf %21, %22 : vector<8x4x24xf32>
    %24 = vector.extract_strided_slice %23 {offsets = [0, 0, 0], sizes = [8, 4, 8], strides = [1, 1, 1]} : vector<8x4x24xf32> to vector<8x4x8xf32>
    %25 = vector.extract_strided_slice %23 {offsets = [0, 0, 8], sizes = [8, 4, 8], strides = [1, 1, 1]} : vector<8x4x24xf32> to vector<8x4x8xf32>
    %26 = vector.extract_strided_slice %23 {offsets = [0, 0, 16], sizes = [8, 4, 8], strides = [1, 1, 1]} : vector<8x4x24xf32> to vector<8x4x8xf32>
    "tpu.trace_start"() <{level = 10 : i32, message = "bqe,bke->bqk"}> : () -> ()
    %cst_12 = arith.constant dense<0.000000e+00> : vector<8x4x4xf32>
    %27 = tpu.matmul %24, %25, %cst_12 {dimension_numbers = #tpu.dot_dimension_numbers<[2], [2], [1], [1], [0, 0, 0, 1, 1, 1], [0], [0]>} : vector<8x4x8xf32>, vector<8x4x8xf32>, vector<8x4x4xf32> -> vector<8x4x4xf32>
    "tpu.trace_stop"() : () -> ()
    %cst_13 = arith.constant dense<0xFF800000> : vector<8x4xf32>
    %28 = vector.multi_reduction <maximumf>, %27, %cst_13 [2] : vector<8x4x4xf32> to vector<8x4xf32>
    %29 = vector.shape_cast %28 : vector<8x4xf32> to vector<8x4x1xf32>
    %30 = vector.broadcast %29 : vector<8x4x1xf32> to vector<8x4x4xf32>
    %31 = arith.subf %27, %30 : vector<8x4x4xf32>
    %32 = math.exp %31 : vector<8x4x4xf32>
    %cst_14 = arith.constant dense<0.000000e+00> : vector<8x4xf32>
    %33 = vector.multi_reduction <add>, %32, %cst_14 [2] : vector<8x4x4xf32> to vector<8x4xf32>
    %34 = vector.shape_cast %33 : vector<8x4xf32> to vector<8x4x1xf32>
    %35 = tpu.reciprocal %34 {approx = true} : vector<8x4x1xf32> -> vector<8x4x1xf32>
    %36 = vector.broadcast %35 : vector<8x4x1xf32> to vector<8x4x4xf32>
    %37 = arith.mulf %32, %36 : vector<8x4x4xf32>
    "tpu.trace_start"() <{level = 10 : i32, message = "bqk,bke->bqe"}> : () -> ()
    %cst_15 = arith.constant dense<0.000000e+00> : vector<8x4x8xf32>
    %38 = tpu.matmul %37, %26, %cst_15 {dimension_numbers = #tpu.dot_dimension_numbers<[2], [1], [1], [2], [0, 0, 0, 1, 1, 2], [0], [0]>} : vector<8x4x4xf32>, vector<8x4x8xf32>, vector<8x4x8xf32> -> vector<8x4x8xf32>
    "tpu.trace_stop"() : () -> ()
    "tpu.trace_start"() <{level = 10 : i32, message = "bqe,bed->bqd"}> : () -> ()
    %cst_16 = arith.constant dense<0.000000e+00> : vector<8x4x32xf32>
    %39 = tpu.matmul %38, %20, %cst_16 {dimension_numbers = #tpu.dot_dimension_numbers<[2], [1], [1], [2], [0, 0, 0, 1, 1, 2], [0], [0]>} : vector<8x4x8xf32>, vector<8x8x32xf32>, vector<8x4x32xf32> -> vector<8x4x32xf32>
    "tpu.trace_stop"() : () -> ()
    %40 = vector.shape_cast %39 : vector<8x4x32xf32> to vector<2x4x4x32xf32>
    %cst_17 = arith.constant dense<0.000000e+00> : vector<2x4x32xf32>
    %41 = vector.multi_reduction <add>, %40, %cst_17 [1] : vector<2x4x4x32xf32> to vector<2x4x32xf32>
    %c0_18 = arith.constant 0 : index
    %c0_19 = arith.constant 0 : index
    %42 = vector.load %arg5[%c0_18, %c0_19] : memref<1x32xf32, #tpu.memory_space<vmem>>, vector<1x32xf32>
    %43 = vector.shape_cast %42 : vector<1x32xf32> to vector<1x1x32xf32>
    %44 = vector.broadcast %43 : vector<1x1x32xf32> to vector<2x4x32xf32>
    %45 = arith.addf %41, %44 : vector<2x4x32xf32>
    %c0_20 = arith.constant 0 : index
    %c0_21 = arith.constant 0 : index
    %c0_22 = arith.constant 0 : index
    %46 = vector.load %arg6[%c0_20, %c0_21, %c0_22] : memref<2x32x64xf32, #tpu.memory_space<vmem>>, vector<2x32x64xf32>
    "tpu.trace_start"() <{level = 10 : i32, message = "bsd,bdh->bsh"}> : () -> ()
    %cst_23 = arith.constant dense<0.000000e+00> : vector<2x4x64xf32>
    %47 = tpu.matmul %45, %46, %cst_23 {dimension_numbers = #tpu.dot_dimension_numbers<[2], [1], [1], [2], [0, 0, 0, 1, 1, 2], [0], [0]>} : vector<2x4x32xf32>, vector<2x32x64xf32>, vector<2x4x64xf32> -> vector<2x4x64xf32>
    "tpu.trace_stop"() : () -> ()
    %cst_24 = arith.constant 0.000000e+00 : f32
    %48 = vector.broadcast %cst_24 : f32 to vector<2x4x64xf32>
    %49 = arith.maximumf %47, %48 : vector<2x4x64xf32>
    %c0_25 = arith.constant 0 : index
    %c0_26 = arith.constant 0 : index
    %c0_27 = arith.constant 0 : index
    %50 = vector.load %arg7[%c0_25, %c0_26, %c0_27] : memref<2x64x32xf32, #tpu.memory_space<vmem>>, vector<2x64x32xf32>
    "tpu.trace_start"() <{level = 10 : i32, message = "bsh,bhd->bsd"}> : () -> ()
    %cst_28 = arith.constant dense<0.000000e+00> : vector<2x4x32xf32>
    %51 = tpu.matmul %49, %50, %cst_28 {dimension_numbers = #tpu.dot_dimension_numbers<[2], [1], [1], [2], [0, 0, 0, 1, 1, 2], [0], [0]>} : vector<2x4x64xf32>, vector<2x64x32xf32>, vector<2x4x32xf32> -> vector<2x4x32xf32>
    "tpu.trace_stop"() : () -> ()
    %52 = vector.shape_cast %51 : vector<2x4x32xf32> to vector<2x1x4x32xf32>
    %c0_29 = arith.constant 0 : index
    %c0_30 = arith.constant 0 : index
    %c0_31 = arith.constant 0 : index
    %c0_32 = arith.constant 0 : index
    %53 = vector.load %arg8[%c0_29, %c0_30, %c0_31, %c0_32] : memref<2x1x4x32xf32, #tpu.memory_space<vmem>>, vector<2x1x4x32xf32>
    tpu.vector_store %arg8[%c0_29, %c0_30, %c0_31, %c0_32], %52 {strides = array<i32>} : memref<2x1x4x32xf32, #tpu.memory_space<vmem>>, vector<2x1x4x32xf32>,
    return
  }
  func.func @transform_0(%arg0: i32) -> (i32, i32, i32, i32) {
    %c0_i32 = arith.constant 0 : i32
    %c0_i32_0 = arith.constant 0 : i32
    %c0_i32_1 = arith.constant 0 : i32
    %c0_i32_2 = arith.constant 0 : i32
    return %c0_i32, %arg0, %c0_i32_0, %c0_i32_1 : i32, i32, i32, i32
  }
  func.func @transform_1(%arg0: i32) -> (i32, i32, i32) {
    %c0_i32 = arith.constant 0 : i32
    %c0_i32_0 = arith.constant 0 : i32
    %c0_i32_1 = arith.constant 0 : i32
    %c0_i32_2 = arith.constant 0 : i32
    return %c0_i32, %c0_i32_0, %c0_i32_1 : i32, i32, i32
  }
  func.func @transform_2(%arg0: i32) -> (i32, i32, i32) {
    %c0_i32 = arith.constant 0 : i32
    %c0_i32_0 = arith.constant 0 : i32
    %c0_i32_1 = arith.constant 0 : i32
    %c0_i32_2 = arith.constant 0 : i32
    return %c0_i32, %c0_i32_0, %c0_i32_1 : i32, i32, i32
  }
  func.func @transform_3(%arg0: i32) -> (i32, i32, i32) {
    %c0_i32 = arith.constant 0 : i32
    %c0_i32_0 = arith.constant 0 : i32
    %c0_i32_1 = arith.constant 0 : i32
    %c0_i32_2 = arith.constant 0 : i32
    return %c0_i32, %c0_i32_0, %c0_i32_1 : i32, i32, i32
  }
  func.func @transform_4(%arg0: i32) -> (i32, i32) {
    %c0_i32 = arith.constant 0 : i32
    %c0_i32_0 = arith.constant 0 : i32
    %c0_i32_1 = arith.constant 0 : i32
    return %c0_i32, %c0_i32_0 : i32, i32
  }
  func.func @transform_5(%arg0: i32) -> (i32, i32, i32) {
    %c0_i32 = arith.constant 0 : i32
    %c0_i32_0 = arith.constant 0 : i32
    %c0_i32_1 = arith.constant 0 : i32
    %c0_i32_2 = arith.constant 0 : i32
    return %c0_i32, %c0_i32_0, %c0_i32_1 : i32, i32, i32
  }
  func.func @transform_6(%arg0: i32) -> (i32, i32, i32) {
    %c0_i32 = arith.constant 0 : i32
    %c0_i32_0 = arith.constant 0 : i32
    %c0_i32_1 = arith.constant 0 : i32
    %c0_i32_2 = arith.constant 0 : i32
    return %c0_i32, %c0_i32_0, %c0_i32_1 : i32, i32, i32
  }
  func.func @transform_7(%arg0: i32) -> (i32, i32, i32, i32) {
    %c0_i32 = arith.constant 0 : i32
    %c0_i32_0 = arith.constant 0 : i32
    %c0_i32_1 = arith.constant 0 : i32
    %c0_i32_2 = arith.constant 0 : i32
    return %c0_i32, %arg0, %c0_i32_0, %c0_i32_1 : i32, i32, i32, i32
  }
}

module attributes {stable_mosaic.version = 11 : i64} {
  func.func @_block_kernel(%arg0: i32, %arg1: memref<2x1x4x32xf32, #tpu.memory_space<vmem>>, %arg2: memref<4x32x24xf32, #tpu.memory_space<vmem>>, %arg3: memref<4x1x24xf32, #tpu.memory_space<vmem>>, %arg4: memref<4x8x32xf32, #tpu.memory_space<vmem>>, %arg5: memref<1x32xf32, #tpu.memory_space<vmem>>, %arg6: memref<2x32x64xf32, #tpu.memory_space<vmem>>, %arg7: memref<2x64x32xf32, #tpu.memory_space<vmem>>, %arg8: memref<2x1x4x32xf32, #tpu.memory_space<vmem>>) attributes {dimension_semantics = [#tpu.dimension_semantics<parallel>], iteration_bounds = array<i64: 2>, scalar_prefetch = 0 : i64, scratch_operands = 0 : i64, tpu.core_type = #tpu.core_type<tc>, window_params = [{transform_indices = @transform_0, window_bounds = array<i64: 2, 1, 4, 32>}, {pipeline_mode = #tpu.pipeline_mode<synchronous>, transform_indices = @transform_1, window_bounds = array<i64: 4, 32, 24>}, {pipeline_mode = #tpu.pipeline_mode<synchronous>, transform_indices = @transform_2, window_bounds = array<i64: 4, 1, 24>}, {pipeline_mode = #tpu.pipeline_mode<synchronous>, transform_indices = @transform_3, window_bounds = array<i64: 4, 8, 32>}, {pipeline_mode = #tpu.pipeline_mode<synchronous>, transform_indices = @transform_4, window_bounds = array<i64: 1, 32>}, {pipeline_mode = #tpu.pipeline_mode<synchronous>, transform_indices = @transform_5, window_bounds = array<i64: 2, 32, 64>}, {pipeline_mode = #tpu.pipeline_mode<synchronous>, transform_indices = @transform_6, window_bounds = array<i64: 2, 64, 32>}, {transform_indices = @transform_7, window_bounds = array<i64: 2, 1, 4, 32>}]} {
    %c0 = arith.constant 0 : index
    %c0_0 = arith.constant 0 : index
    %c0_1 = arith.constant 0 : index
    %c0_2 = arith.constant 0 : index
    %0 = vector.load %arg1[%c0, %c0_0, %c0_1, %c0_2] : memref<2x1x4x32xf32, #tpu.memory_space<vmem>>, vector<2x1x4x32xf32>
    %1 = vector.shape_cast %0 : vector<2x1x4x32xf32> to vector<2x4x32xf32>
    %2 = vector.shape_cast %1 : vector<2x4x32xf32> to vector<2x1x4x32xf32>
    %3 = vector.shape_cast %2 : vector<2x1x4x32xf32> to vector<2x1x4x32xf32>
    %4 = vector.broadcast %3 : vector<2x1x4x32xf32> to vector<2x4x4x32xf32>
    %5 = vector.shape_cast %4 : vector<2x4x4x32xf32> to vector<8x4x32xf32>
    %c0_3 = arith.constant 0 : index
    %c0_4 = arith.constant 0 : index
    %c0_5 = arith.constant 0 : index
    %6 = vector.load %arg2[%c0_3, %c0_4, %c0_5] : memref<4x32x24xf32, #tpu.memory_space<vmem>>, vector<4x32x24xf32>
    %7 = vector.shape_cast %6 : vector<4x32x24xf32> to vector<1x4x32x24xf32>
    %8 = vector.shape_cast %7 : vector<1x4x32x24xf32> to vector<1x4x32x24xf32>
    %9 = vector.broadcast %8 : vector<1x4x32x24xf32> to vector<2x4x32x24xf32>
    %10 = vector.shape_cast %9 : vector<2x4x32x24xf32> to vector<8x32x24xf32>
    %c0_6 = arith.constant 0 : index
    %c0_7 = arith.constant 0 : index
    %c0_8 = arith.constant 0 : index
    %11 = vector.load %arg3[%c0_6, %c0_7, %c0_8] : memref<4x1x24xf32, #tpu.memory_space<vmem>>, vector<4x1x24xf32>
    %12 = vector.shape_cast %11 : vector<4x1x24xf32> to vector<1x4x1x24xf32>
    %13 = vector.shape_cast %12 : vector<1x4x1x24xf32> to vector<1x4x1x24xf32>
    %14 = vector.broadcast %13 : vector<1x4x1x24xf32> to vector<2x4x1x24xf32>
    %15 = vector.shape_cast %14 : vector<2x4x1x24xf32> to vector<8x1x24xf32>
    %c0_9 = arith.constant 0 : index
    %c0_10 = arith.constant 0 : index
    %c0_11 = arith.constant 0 : index
    %16 = vector.load %arg4[%c0_9, %c0_10, %c0_11] : memref<4x8x32xf32, #tpu.memory_space<vmem>>, vector<4x8x32xf32>
    %17 = vector.shape_cast %16 : vector<4x8x32xf32> to vector<1x4x8x32xf32>
    %18 = vector.shape_cast %17 : vector<1x4x8x32xf32> to vector<1x4x8x32xf32>
    %19 = vector.broadcast %18 : vector<1x4x8x32xf32> to vector<2x4x8x32xf32>
    %20 = vector.shape_cast %19 : vector<2x4x8x32xf32> to vector<8x8x32xf32>
    "tpu.trace_start"() <{level = 10 : i32, message = "bsd,bde->bse"}> : () -> ()
    %cst = arith.constant dense<0.000000e+00> : vector<8x4x24xf32>
    %21 = tpu.matmul %5, %10, %cst {dimension_numbers = #tpu.dot_dimension_numbers<[2], [1], [1], [2], [0, 0, 0, 1, 1, 2], [0], [0]>} : vector<8x4x32xf32>, vector<8x32x24xf32>, vector<8x4x24xf32> -> vector<8x4x24xf32>
    "tpu.trace_stop"() : () -> ()
    %22 = vector.broadcast %15 : vector<8x1x24xf32> to vector<8x4x24xf32>
    %23 = arith.addf %21, %22 : vector<8x4x24xf32>
    %24 = vector.extract_strided_slice %23 {offsets = [0, 0, 0], sizes = [8, 4, 8], strides = [1, 1, 1]} : vector<8x4x24xf32> to vector<8x4x8xf32>
    %25 = vector.extract_strided_slice %23 {offsets = [0, 0, 8], sizes = [8, 4, 8], strides = [1, 1, 1]} : vector<8x4x24xf32> to vector<8x4x8xf32>
    %26 = vector.extract_strided_slice %23 {offsets = [0, 0, 16], sizes = [8, 4, 8], strides = [1, 1, 1]} : vector<8x4x24xf32> to vector<8x4x8xf32>
    "tpu.trace_start"() <{level = 10 : i32, message = "bqe,bke->bqk"}> : () -> ()
    %cst_12 = arith.constant dense<0.000000e+00> : vector<8x4x4xf32>
    %27 = tpu.matmul %24, %25, %cst_12 {dimension_numbers = #tpu.dot_dimension_numbers<[2], [2], [1], [1], [0, 0, 0, 1, 1, 1], [0], [0]>} : vector<8x4x8xf32>, vector<8x4x8xf32>, vector<8x4x4xf32> -> vector<8x4x4xf32>
    "tpu.trace_stop"() : () -> ()
    %cst_13 = arith.constant dense<0xFF800000> : vector<8x4xf32>
    %28 = vector.multi_reduction <maximumf>, %27, %cst_13 [2] : vector<8x4x4xf32> to vector<8x4xf32>
    %29 = vector.shape_cast %28 : vector<8x4xf32> to vector<8x4x1xf32>
    %30 = vector.broadcast %29 : vector<8x4x1xf32> to vector<8x4x4xf32>
    %31 = arith.subf %27, %30 : vector<8x4x4xf32>
    %32 = math.exp %31 : vector<8x4x4xf32>
    %cst_14 = arith.constant dense<0.000000e+00> : vector<8x4xf32>
    %33 = vector.multi_reduction <add>, %32, %cst_14 [2] : vector<8x4x4xf32> to vector<8x4xf32>
    %34 = vector.shape_cast %33 : vector<8x4xf32> to vector<8x4x1xf32>
    %35 = tpu.reciprocal %34 {approx = true} : vector<8x4x1xf32> -> vector<8x4x1xf32>
    %36 = vector.broadcast %35 : vector<8x4x1xf32> to vector<8x4x4xf32>
    %37 = arith.mulf %32, %36 : vector<8x4x4xf32>
    "tpu.trace_start"() <{level = 10 : i32, message = "bqk,bke->bqe"}> : () -> ()
    %cst_15 = arith.constant dense<0.000000e+00> : vector<8x4x8xf32>
    %38 = tpu.matmul %37, %26, %cst_15 {dimension_numbers = #tpu.dot_dimension_numbers<[2], [1], [1], [2], [0, 0, 0, 1, 1, 2], [0], [0]>} : vector<8x4x4xf32>, vector<8x4x8xf32>, vector<8x4x8xf32> -> vector<8x4x8xf32>
    "tpu.trace_stop"() : () -> ()
    "tpu.trace_start"() <{level = 10 : i32, message = "bqe,bed->bqd"}> : () -> ()
    %cst_16 = arith.constant dense<0.000000e+00> : vector<8x4x32xf32>
    %39 = tpu.matmul %38, %20, %cst_16 {dimension_numbers = #tpu.dot_dimension_numbers<[2], [1], [1], [2], [0, 0, 0, 1, 1, 2], [0], [0]>} : vector<8x4x8xf32>, vector<8x8x32xf32>, vector<8x4x32xf32> -> vector<8x4x32xf32>
    "tpu.trace_stop"() : () -> ()
    %40 = vector.shape_cast %39 : vector<8x4x32xf32> to vector<2x4x4x32xf32>
    %cst_17 = arith.constant dense<0.000000e+00> : vector<2x4x32xf32>
    %41 = vector.multi_reduction <add>, %40, %cst_17 [1] : vector<2x4x4x32xf32> to vector<2x4x32xf32>
    %c0_18 = arith.constant 0 : index
    %c0_19 = arith.constant 0 : index
    %42 = vector.load %arg5[%c0_18, %c0_19] : memref<1x32xf32, #tpu.memory_space<vmem>>, vector<1x32xf32>
    %43 = vector.shape_cast %42 : vector<1x32xf32> to vector<1x1x32xf32>
    %44 = vector.broadcast %43 : vector<1x1x32xf32> to vector<2x4x32xf32>
    %45 = arith.addf %41, %44 : vector<2x4x32xf32>
    %c0_20 = arith.constant 0 : index
    %c0_21 = arith.constant 0 : index
    %c0_22 = arith.constant 0 : index
    %46 = vector.load %arg6[%c0_20, %c0_21, %c0_22] : memref<2x32x64xf32, #tpu.memory_space<vmem>>, vector<2x32x64xf32>
    "tpu.trace_start"() <{level = 10 : i32, message = "bsd,bdh->bsh"}> : () -> ()
    %cst_23 = arith.constant dense<0.000000e+00> : vector<2x4x64xf32>
    %47 = tpu.matmul %45, %46, %cst_23 {dimension_numbers = #tpu.dot_dimension_numbers<[2], [1], [1], [2], [0, 0, 0, 1, 1, 2], [0], [0]>} : vector<2x4x32xf32>, vector<2x32x64xf32>, vector<2x4x64xf32> -> vector<2x4x64xf32>
    "tpu.trace_stop"() : () -> ()
    %cst_24 = arith.constant 0.000000e+00 : f32
    %48 = vector.broadcast %cst_24 : f32 to vector<2x4x64xf32>
    %49 = arith.maximumf %47, %48 : vector<2x4x64xf32>
    %c0_25 = arith.constant 0 : index
    %c0_26 = arith.constant 0 : index
    %c0_27 = arith.constant 0 : index
    %50 = vector.load %arg7[%c0_25, %c0_26, %c0_27] : memref<2x64x32xf32, #tpu.memory_space<vmem>>, vector<2x64x32xf32>
    "tpu.trace_start"() <{level = 10 : i32, message = "bsh,bhd->bsd"}> : () -> ()
    %cst_28 = arith.constant dense<0.000000e+00> : vector<2x4x32xf32>
    %51 = tpu.matmul %49, %50, %cst_28 {dimension_numbers = #tpu.dot_dimension_numbers<[2], [1], [1], [2], [0, 0, 0, 1, 1, 2], [0], [0]>} : vector<2x4x64xf32>, vector<2x64x32xf32>, vector<2x4x32xf32> -> vector<2x4x32xf32>
    "tpu.trace_stop"() : () -> ()
    %52 = vector.shape_cast %51 : vector<2x4x32xf32> to vector<2x1x4x32xf32>
    %c0_29 = arith.constant 0 : index
    %c0_30 = arith.constant 0 : index
    %c0_31 = arith.constant 0 : index
    %c0_32 = arith.constant 0 : index
    %53 = vector.load %arg8[%c0_29, %c0_30, %c0_31, %c0_32] : memref<2x1x4x32xf32, #tpu.memory_space<vmem>>, vector<2x1x4x32xf32>
    tpu.vector_store %arg8[%c0_29, %c0_30, %c0_31, %c0_32], %52 {strides = array<i32>} : memref<2x1x4x32xf32, #tpu.memory_space<vmem>>, vector<2x1x4x32xf32>,
    return
  }
  func.func @transform_0(%arg0: i32) -> (i32, i32, i32, i32) {
    %c0_i32 = arith.constant 0 : i32
    %c0_i32_0 = arith.constant 0 : i32
    %c0_i32_1 = arith.constant 0 : i32
    %c0_i32_2 = arith.constant 0 : i32
    return %c0_i32, %arg0, %c0_i32_0, %c0_i32_1 : i32, i32, i32, i32
  }
  func.func @transform_1(%arg0: i32) -> (i32, i32, i32) {
    %c0_i32 = arith.constant 0 : i32
    %c0_i32_0 = arith.constant 0 : i32
    %c0_i32_1 = arith.constant 0 : i32
    %c0_i32_2 = arith.constant 0 : i32
    return %c0_i32, %c0_i32_0, %c0_i32_1 : i32, i32, i32
  }
  func.func @transform_2(%arg0: i32) -> (i32, i32, i32) {
    %c0_i32 = arith.constant 0 : i32
    %c0_i32_0 = arith.constant 0 : i32
    %c0_i32_1 = arith.constant 0 : i32
    %c0_i32_2 = arith.constant 0 : i32
    return %c0_i32, %c0_i32_0, %c0_i32_1 : i32, i32, i32
  }
  func.func @transform_3(%arg0: i32) -> (i32, i32, i32) {
    %c0_i32 = arith.constant 0 : i32
    %c0_i32_0 = arith.constant 0 : i32
    %c0_i32_1 = arith.constant 0 : i32
    %c0_i32_2 = arith.constant 0 : i32
    return %c0_i32, %c0_i32_0, %c0_i32_1 : i32, i32, i32
  }
  func.func @transform_4(%arg0: i32) -> (i32, i32) {
    %c0_i32 = arith.constant 0 : i32
    %c0_i32_0 = arith.constant 0 : i32
    %c0_i32_1 = arith.constant 0 : i32
    return %c0_i32, %c0_i32_0 : i32, i32
  }
  func.func @transform_5(%arg0: i32) -> (i32, i32, i32) {
    %c0_i32 = arith.constant 0 : i32
    %c0_i32_0 = arith.constant 0 : i32
    %c0_i32_1 = arith.constant 0 : i32
    %c0_i32_2 = arith.constant 0 : i32
    return %c0_i32, %c0_i32_0, %c0_i32_1 : i32, i32, i32
  }
  func.func @transform_6(%arg0: i32) -> (i32, i32, i32) {
    %c0_i32 = arith.constant 0 : i32
    %c0_i32_0 = arith.constant 0 : i32
    %c0_i32_1 = arith.constant 0 : i32
    %c0_i32_2 = arith.constant 0 : i32
    return %c0_i32, %c0_i32_0, %c0_i32_1 : i32, i32, i32
  }
  func.func @transform_7(%arg0: i32) -> (i32, i32, i32, i32) {
    %c0_i32 = arith.constant 0 : i32
    %c0_i32_0 = arith.constant 0 : i32
    %c0_i32_1 = arith.constant 0 : i32
    %c0_i32_2 = arith.constant 0 : i32
    return %c0_i32, %arg0, %c0_i32_0, %c0_i32_1 : i32, i32, i32, i32
  }
}

</mosaic_0001>

<bundles_post_ra>
// kernel: simple_transformer_moe_forward.3
= control target key start
LH: loop header
LB: loop body
LE: loop exit
PB: predicated region body
PF: predicated region fallthrough
CT: control target
= control target key end

     0   :  { %12 = vsyncpa [#allocation4], 0  ;;  %s2105_s0 = inlined_call_operand.vmem [shape: f32[2,2,4,32], index: 0, kind: input, shape index: {}]   ;;  %s2106_s1 = inlined_call_operand.vmem [shape: f32[4,32,24], index: 1, kind: input, shape index: {}]   ;;  %s2107_s2 = inlined_call_operand.vmem [shape: f32[4,1,24], index: 2, kind: input, shape index: {}]   ;;  %s2108_s3 = inlined_call_operand.vmem [shape: f32[4,8,32], index: 3, kind: input, shape index: {}]   ;;  %s2109_s4 = inlined_call_operand.vmem [shape: f32[1,32], index: 4, kind: input, shape index: {}]   ;;  %s2110_s5 = inlined_call_operand.vmem [shape: f32[2,32,64], index: 5, kind: input, shape index: {}]   ;;  %s2111_s6 = inlined_call_operand.vmem [shape: f32[2,64,32], index: 6, kind: input, shape index: {}]   ;;  %s2112_s7 = inlined_call_operand.hbm [shape: f32[2,2,4,32], index: 7, kind: output, shape index: {}]  }
   0x1   :  { %14 = vsyncpa [#allocation4 + $0x1], 0  ;;  %s1716_s24 = smov 0   ;;  %s1718_s25 = smov 0  }
   0x2   :  { %s1720_s26 = smov 0   ;;  %s1722_s27 = smov 0  }
   0x3 LB: > { %s1461_s28 = sadd.s32 4294967295, %s1669_s27   ;;  %s1462_s29 = sadd.s32 4294967294, %s1669_s27   ;;  %s1669_s27 = sphi %s1722_s27, %s2118_s27   ;;  %s1665_s26 = sphi %s1720_s26, %s2117_s26   ;;  %s1661_s25 = sphi %s1718_s25, %s2116_s25   ;;  %s1657_s24 = sphi %s1716_s24, %s2115_s24  }
   0x4   : > { %s1739_s30 = sadd.s32 1, %s1669_s27   ;;  %s27_s8 = sadd.s32 1, %s1665_s26 }
   0x5   : > { %s24_s9 = ssub.s32 %s1669_s27, %s1739_s30  ;;  %p34_p0 = scmp.ne.s32.totalorder %s1665_s26, %s1661_s25 }
   0x6   : > { %p25_p1 = scmp.eq.s32.totalorder %s24_s9, 0  ;;  %p35_p2 = scmp.eq.s32.totalorder %s1669_s27, 0 }
   0x7   : > { %p190_p3 = scmp.eq.s32.totalorder %s1461_s28, 1  ;;  %p195_p4 = scmp.ne.s32.totalorder %s1661_s25, %s1657_s24 }
   0x8   : > { %s1752_s10 = scalar_select %p25_p1, %s1665_s26, %s27_s8  }
   0x9   : > { %p36_p5 = por %p35_p2, %p34_p0  ;;  %p1754_p6 = por %p190_p3, %p34_p0 }
   0xa   : > { %p196_p7 = scmp.eq.s32.totalorder %s1462_s29, 1  ;;  %p1464_p9 = scmp.ge.s32.totalorder %s1669_s27, 2 }
   0xc   : > { %p1758_p8 = por %p196_p7, %p195_p4  ;;  %230 = sbr.rel (%p1464_p9) target bundleno = 23 (0x17), region = 40 }
  0x11   : > { %233 = sbr.rel (!%p36_p5) target bundleno = 23 (0x17), region = 44  ;;  %s235_s13 = sand.u32 (%p36_p5), 1, %s1665_s26  }
  0x12   : > { %s1466_s14 = sshll.u32 (%p36_p5), %s1669_s27, 2  ;;  %s1465_s15 = sshll.u32 (%p36_p5), %s235_s13, 3 }
  0x13   : > { %s239_s18 = scalar_lea.vmem (%p36_p5), %s2105_s0, %s1466_s14  ;;  %s237_s19 = scalar_lea.vmem (%p36_p5), [#allocation2], %s1465_s15 }
  0x14   : > { %v256_v0 = vld [vmem:[%s239_s18] sm:$0xf] (%p36_p5)  ;;  %v258_v1 = vld [vmem:[%s239_s18 + $0x8] sm:$0xf] (%p36_p5) }
  0x15   : > { %257 = vst [vmem:[%s237_s19] sm:$0xf] (%p36_p5), %v256_v0 }
  0x16   : > { %259 = vst [vmem:[%s237_s19 + $0x4] sm:$0xf] %v258_v1 }
  0x17 PF: > { %p1467_p10 = scmp.ge.s32.totalorder %s1669_s27, 1  ;;  %p286_p11 = scmp.lt.s32.totalorder %s1669_s27, 3 }
  0x19   : > { %p287_p12 = pnand %p1467_p10, %p286_p11 }
  0x1a   : > { %s293_s9 = sand.u32 (!%p287_p12), 1, %s1661_s25   ;;  %s1671_s19 = smov (!%p287_p12), 120  }
  0x1b   : > { %290 = sbr.rel (%p287_p12) target bundleno = 1320 (0x528), region = 85  ;;  %s1787_s15 = sshll.u32 (!%p287_p12), %s293_s9, 3 }
  0x1c   : > { %s295_s20 = scalar_lea.vmem (!%p287_p12), [#allocation2], %s1787_s15  ;;  %s1672_s13 = smov (!%p287_p12), 112  }
  0x1d   : > { %s323_s8 = scalar_lea.vmem (!%p287_p12), [#allocation3], %s1787_s15  ;;  %s1627_s23 = scalar_lea.hbm (!%p287_p12), %s2112_s7, 16 }
  0x1e   : > { %s1391_s18 = sshll.u32 (!%p287_p12), %s323_s8, 4  ;;  %s1392_s18 = int_to_ptr.vmem [resolvable:$true] %s1391_s18 }
  0x20   : > { %v329_v2 = vld [vmem:[%s2106_s1 + $0x18] sm:$0xff]  ;;  %v328_v4 = vld [vmem:[%s2106_s1 + $0x10] sm:$0xff]  ;;  %v327_v6 = vld [vmem:[%s2106_s1 + $0x8] sm:$0xff]  ;;  %vm362_vm0 = vcmask 261120   ;;  %vm532_vm1 = vcmask 64512   ;;  %vm746_vm2 = vcmask 27648  }
  0x21   : > { %v337_v3 = vld [vmem:[%s2106_s1 + $0x58] sm:$0xff]  ;;  %378 = vmatpush.msra.mxu0 %v329_v2  ;;  %v336_v5 = vld [vmem:[%s2106_s1 + $0x50] sm:$0xff]  ;;  %v335_v7 = vld [vmem:[%s2106_s1 + $0x48] sm:$0xff]  ;;  %vm841_vm3 = vcmask 1043456   ;;  %vm837_vm4 = vcmask 31744   ;;  %vm1237_vm5 = vcmask 257024  }
  0x22   : > { %418 = vmatpush.msra.mxu2 %v337_v3  ;;  %v333_v8 = vld [vmem:[%s2106_s1 + $0x38] sm:$0xff]  ;;  %v332_v10 = vld [vmem:[%s2106_s1 + $0x30] sm:$0xff]  ;;  %v326_v11 = vld [vmem:[%s2106_s1] sm:$0xff]  ;;  %vm1330_vm6 = vcmask 523264  }
  0x23   : > { %379 = vmatpush.msra.mxu0 %v328_v4  ;;  %v341_v9 = vld [vmem:[%s2106_s1 + $0x78] sm:$0xff]  ;;  %v334_v12 = vld [vmem:[%s2106_s1 + $0x40] sm:$0xff]  ;;  %398 = vmatpush.msra.mxu1 %v333_v8  ;;  %v340_v13 = vld [vmem:[%s2106_s1 + $0x70] sm:$0xff] }
  0x24   : > { %419 = vmatpush.msra.mxu2 %v336_v5  ;;  %438 = vmatpush.msra.mxu3 %v341_v9  ;;  %v324_v14 = vld [vmem:[%s295_s20] sm:$0xf]  ;;  %v325_v19 = vld [vmem:[%s295_s20 + $0x4] sm:$0xf]  ;;  %s1380_s20 = scalar_lea.sflag [#allocation4], %s293_s9 }
  0x25   : > { %380 = vmatpush.msra.mxu0 %v327_v6  ;;  %399 = vmatpush.msra.mxu1 %v332_v10  ;;  %v331_v15 = vld [vmem:[%s2106_s1 + $0x28] sm:$0xff]  ;;  %v330_v17 = vld [vmem:[%s2106_s1 + $0x20] sm:$0xff] }
  0x26   : > { %420 = vmatpush.msra.mxu2 %v335_v7  ;;  %439 = vmatpush.msra.mxu3 %v340_v13  ;;  %v339_v16 = vld [vmem:[%s2106_s1 + $0x68] sm:$0xff]  ;;  %v338_v18 = vld [vmem:[%s2106_s1 + $0x60] sm:$0xff] }
  0x27   : > { %381 = vmatpush.msra.mxu0 %v326_v11  ;;  %400 = vmatpush.msra.mxu1 %v331_v15  ;;  %v1570_v20 = vld [vmem:[%s2107_s2] ss:$0 sm:$0xff]  ;;  %v1571_v23 = vld [vmem:[%s2107_s2 + $0x2] ss:$0 sm:$0xff]  ;;  %v1572_v24 = vld [vmem:[%s2107_s2 + $0x1] ss:$0 sm:$0xff] }
  0x28   : > { %421 = vmatpush.msra.mxu2 %v334_v12  ;;  %1470 = vmatmul.msk.f32.vlgmr.msra.gmra.mxu0 %vm362_vm0, %v324_v14  ;;  %v1573_v29 = vld [vmem:[%s2107_s2 + $0x3] ss:$0 sm:$0xff] }
  0x29   : > { %1472 = vmatmul.msk.f32.vlgmr.msra.gmra.mxu2 %vm362_vm0, %v324_v14  ;;  %440 = vmatpush.msra.mxu3 %v339_v16 }
  0x2a   : > { %501 = vmatpush.msrb.mxu2 %v337_v3  ;;  %461 = vmatpush.msrb.mxu0 %v329_v2 }
  0x2b   : > { %401 = vmatpush.msra.mxu1 %v330_v17  ;;  %441 = vmatpush.msra.mxu3 %v338_v18 }
  0x2c   : > { %502 = vmatpush.msrb.mxu2 %v336_v5  ;;  %1471 = vmatmul.msk.f32.vlgmr.msra.gmra.mxu1 %vm362_vm0, %v324_v14 }
  0x2d   : > { %1473 = vmatmul.msk.f32.vlgmr.msra.gmra.mxu3 %vm362_vm0, %v324_v14  ;;  %462 = vmatpush.msrb.mxu0 %v328_v4 }
  0x2e   : > { %503 = vmatpush.msrb.mxu2 %v335_v7  ;;  %521 = vmatpush.msrb.mxu3 %v341_v9 }
  0x2f   : > { %481 = vmatpush.msrb.mxu1 %v333_v8  ;;  %463 = vmatpush.msrb.mxu0 %v327_v6 }
  0x30   : > { %504 = vmatpush.msrb.mxu2 %v334_v12  ;;  %522 = vmatpush.msrb.mxu3 %v340_v13 }
  0x31   : > { %1476 = vmatmul.msk.f32.vlgmr.msrb.gmra.mxu2 %vm362_vm0, %v325_v19  ;;  %482 = vmatpush.msrb.mxu1 %v332_v10 }
  0x32   : > { %523 = vmatpush.msrb.mxu3 %v339_v16  ;;  %464 = vmatpush.msrb.mxu0 %v326_v11 }
  0x33   : > { %483 = vmatpush.msrb.mxu1 %v331_v15  ;;  %1474 = vmatmul.msk.f32.vlgmr.msrb.gmra.mxu0 %vm362_vm0, %v325_v19 }
  0x34   : > { %524 = vmatpush.msrb.mxu3 %v338_v18 }
  0x35   : > { %1477 = vmatmul.msk.f32.vlgmr.msrb.gmra.mxu3 %vm362_vm0, %v325_v19  ;;  %484 = vmatpush.msrb.mxu1 %v330_v17 }
  0x36   : > { %1475 = vmatmul.msk.f32.vlgmr.msrb.gmra.mxu1 %vm362_vm0, %v325_v19 }
  0xa5   : > { %v383_v21 = vpop.f32.mrf.mxu0 }
  0xa6   : > { %v1837_v22 = vadd.f32 %v1570_v20, %v383_v21 }
  0xa8   : > { %530 = vrot.lane.b32.xlu2 %v1837_v22, %s1671_s19 }
  0xa9   : > { %v403_v25 = vpop.f32.mrf.mxu1 }
  0xaa   : > { %v1848_v28 = vadd.f32 %v1572_v24, %v403_v25 }
  0xac   : > { %v423_v26 = vpop.f32.mrf.mxu2 }
  0xad   : > { %v1846_v27 = vadd.f32 %v1571_v23, %v423_v26 }
  0xaf   : > { %585 = vrot.lane.b32.xlu0 %v1846_v27, %s1671_s19 }
  0xb0   : > { %558 = vrot.lane.b32.xlu2 %v1848_v28, %s1671_s19  ;;  %v443_v30 = vpop.f32.mrf.mxu3  ;;  %v466_v34 = vpop.f32.mrf.mxu0 }
  0xb1   : > { %v1855_v31 = vadd.f32 %v1573_v29, %v443_v30  ;;  %v1861_v36 = vadd.f32 %v1570_v20, %v466_v34 }
  0xb3   : > { %v486_v38 = vpop.f32.mrf.mxu1 }
  0xb4   : > { %v506_v32 = vpop.f32.mrf.mxu2  ;;  %v1867_v39 = vadd.f32 %v1572_v24, %v486_v38 }
  0xb5   : > { %v1857_v33 = vadd.f32 %v1571_v23, %v506_v32 }
  0xb7   : > { %693 = vrot.lane.b32.xlu1 %v1857_v33, %s1671_s19  ;;  %612 = vrot.lane.b32.xlu0 %v1855_v31, %s1671_s19 }
  0xb8   : > { %v526_v35 = vpop.f32.mrf.mxu3 }
  0xb9   : > { %v1863_v37 = vadd.f32 %v1573_v29, %v526_v35 }
  0xbf   : > { %720 = vrot.lane.b32.xlu1 %v1863_v37, %s1671_s19  ;;  %639 = vrot.lane.b32.xlu0 %v1861_v36, %s1671_s19 }
  0xc7   : > { %666 = vrot.lane.b32.xlu1 %v1867_v39, %s1671_s19 }
 0x102   : > { %v531_v40 = vpop.permute.xlu2 %530 }
 0x103   : > { %1478 = vmatpush.xpose.msk.msra.mxu0 %vm532_vm1, %v531_v40 }
 0x106   : > { %1479 = vmatmul.msk.f32.vlgmr.msra.gmra.mxu0 %vm532_vm1, %v1837_v22 }
 0x10a   : > { %v559_v41 = vpop.permute.xlu2 %558 }
 0x10b   : > { %1480 = vmatpush.xpose.msk.msra.mxu1 %vm532_vm1, %v559_v41 }
 0x10e   : > { %1481 = vmatmul.msk.f32.vlgmr.msra.gmra.mxu1 %vm532_vm1, %v1848_v28 }
 0x121   : > { %v586_v42 = vpop.permute.xlu0 %585 }
 0x122   : > { %1482 = vmatpush.xpose.msk.msra.mxu2 %vm532_vm1, %v586_v42 }
 0x125   : > { %1483 = vmatmul.msk.f32.vlgmr.msra.gmra.mxu2 %vm532_vm1, %v1846_v27 }
 0x129   : > { %v694_v43 = vpop.permute.xlu1 %693  ;;  %v613_v44 = vpop.permute.xlu0 %612 }
 0x12a   : > { %1484 = vmatpush.xpose.msk.msra.mxu3 %vm532_vm1, %v613_v44  ;;  %1490 = vmatpush.xpose.msk.msrb.mxu2 %vm532_vm1, %v694_v43 }
 0x12d   : > { %1485 = vmatmul.msk.f32.vlgmr.msra.gmra.mxu3 %vm532_vm1, %v1855_v31  ;;  %1491 = vmatmul.msk.f32.vlgmr.msrb.gmra.mxu2 %vm532_vm1, %v1857_v33 }
 0x131   : > { %v721_v45 = vpop.permute.xlu1 %720  ;;  %v640_v46 = vpop.permute.xlu0 %639 }
 0x132   : > { %1486 = vmatpush.xpose.msk.msrb.mxu0 %vm532_vm1, %v640_v46  ;;  %1492 = vmatpush.xpose.msk.msrb.mxu3 %vm532_vm1, %v721_v45 }
 0x135   : > { %1487 = vmatmul.msk.f32.vlgmr.msrb.gmra.mxu0 %vm532_vm1, %v1861_v36  ;;  %1493 = vmatmul.msk.f32.vlgmr.msrb.gmra.mxu3 %vm532_vm1, %v1863_v37 }
 0x139   : > { %v667_v47 = vpop.permute.xlu1 %666 }
 0x13a   : > { %1488 = vmatpush.xpose.msk.msrb.mxu1 %vm532_vm1, %v667_v47 }
 0x13d   : > { %1489 = vmatmul.msk.f32.vlgmr.msrb.gmra.mxu1 %vm532_vm1, %v1867_v39 }
 0x183   : > { %v554_v48 = vpop.f32.mrf.mxu0 }
 0x184   : > { %v747_v49 = vsel %vm746_vm2, %v554_v48, -inf }
 0x185   : > { %748 = vmax.xlane.f32.xlu2 %v747_v49 }
 0x18b   : > { %v581_v50 = vpop.f32.mrf.mxu1 }
 0x18c   : > { %v750_v51 = vsel %vm746_vm2, %v581_v50, -inf }
 0x18d   : > { %751 = vmax.xlane.f32.xlu2 %v750_v51 }
 0x1a8   : > { %v608_v52 = vpop.f32.mrf.mxu2 }
 0x1a9   : > { %v753_v63 = vsel %vm746_vm2, %v608_v52, -inf }
 0x1b0   : > { %v635_v53 = vpop.f32.mrf.mxu3  ;;  %v716_v57 = vpop.f32.mrf.mxu2 }
 0x1b1   : > { %v756_v54 = vsel %vm746_vm2, %v635_v53, -inf  ;;  %v765_v61 = vsel %vm746_vm2, %v716_v57, -inf }
 0x1b2   : > { %757 = vmax.xlane.f32.xlu0 %v756_v54  ;;  %v662_v55 = vpop.f32.mrf.mxu0 }
 0x1b3   : > { %v759_v56 = vsel %vm746_vm2, %v662_v55, -inf }
 0x1b4   : > { %760 = vmax.xlane.f32.xlu1 %v759_v56 }
 0x1b8   : > { %v1898_v58 = vpop.f32.mrf.mxu3 }
 0x1b9   : > { %v768_v59 = vsel %vm746_vm2, %v1898_v58, -inf }
 0x1ba   : > { %769 = vmax.xlane.f32.xlu0 %v768_v59  ;;  %v1902_v60 = vpop.f32.mrf.mxu1 }
 0x1bb   : > { %v762_v62 = vsel %vm746_vm2, %v1902_v60, -inf }
 0x1bc   : > { %766 = vmax.xlane.f32.xlu1 %v765_v61  ;;  %763 = vmax.xlane.f32.xlu2 %v762_v62 }
 0x1c4   : > { %754 = vmax.xlane.f32.xlu2 %v753_v63 }
 0x1ce   : > { %891 = vrot.lane.b32.xlu0 %v1846_v27, %s1672_s13 }
 0x1f8   : > { %v749_v0 = vpop.xlane.xlu2 %748 }
 0x1f9   : > { %v771_v1 = vsub.f32 %v554_v48, %v749_v0 }
 0x1fb   : > { %v779_v2 = vmul.f32 1.442695, %v771_v1 }
 0x1fd   : > { %1575 = vpow2.f32 %v779_v2 }
 0x200   : > { %v752_v3 = vpop.xlane.xlu2 %751 }
 0x201   : > { %v772_v4 = vsub.f32 %v581_v50, %v752_v3 }
 0x203   : > { %v1910_v5 = vpop.eup %1575  ;;  %v781_v6 = vmul.f32 1.442695, %v772_v4 }
 0x204   : > { %v795_v7 = vsel %vm746_vm2, %v1910_v5, 0.0 }
 0x205   : > { %1577 = vpow2.f32 %v781_v6  ;;  %796 = vadd.xlane.f32.xlu1 %v795_v7 }
 0x20b   : > { %v1914_v8 = vpop.eup %1577 }
 0x20c   : > { %v798_v9 = vsel %vm746_vm2, %v1914_v8, 0.0 }
 0x20d   : > { %799 = vadd.xlane.f32.xlu2 %v798_v9  ;;  %v346_v9 = vld [vmem:[%s2108_s3] sm:$0xff] }
 0x225   : > { %v758_v10 = vpop.xlane.xlu0 %757 }
 0x226   : > { %v774_v11 = vsub.f32 %v635_v53, %v758_v10  ;;  %v348_v10 = vld [vmem:[%s2108_s3 + $0x10] sm:$0xff] }
 0x227   : > { %v761_v12 = vpop.xlane.xlu1 %760 }
 0x228   : > { %v785_v13 = vmul.f32 1.442695, %v774_v11  ;;  %v775_v25 = vsub.f32 %v662_v55, %v761_v12  ;;  %v347_v11 = vld [vmem:[%s2108_s3 + $0x8] sm:$0xff] }
 0x22a   : > { %1579 = vpow2.f32 %v785_v13  ;;  %v787_v29 = vmul.f32 1.442695, %v775_v25 }
 0x22d   : > { %v770_v21 = vpop.xlane.xlu0 %769 }
 0x22e   : > { %v778_v42 = vsub.f32 %v1898_v58, %v770_v21  ;;  %v1260_v21 = vld [vmem:[%s2110_s5 + $0x10] sm:$0xff] }
 0x22f   : > { %v767_v14 = vpop.xlane.xlu1 %766  ;;  %v764_v15 = vpop.xlane.xlu2 %763 }
 0x230   : > { %v1580_v16 = vpop.eup %1579  ;;  %v777_v17 = vsub.f32 %v716_v57, %v767_v14 }
 0x231   : > { %v804_v18 = vsel %vm746_vm2, %v1580_v16, 0.0 }
 0x232   : > { %v791_v19 = vmul.f32 1.442695, %v777_v17  ;;  %805 = vadd.xlane.f32.xlu1 %v804_v18 }
 0x234   : > { %1581 = vpow2.f32 %v791_v19 }
 0x237   : > { %v755_v20 = vpop.xlane.xlu2 %754 }
 0x238   : > { %v773_v23 = vsub.f32 %v608_v52, %v755_v20  ;;  %v1261_v20 = vld [vmem:[%s2110_s5 + $0x18] sm:$0xff] }
 0x23a   : > { %v1919_v24 = vpop.eup %1581  ;;  %v783_v26 = vmul.f32 1.442695, %v773_v23  ;;  %v1259_v23 = vld [vmem:[%s2110_s5 + $0x8] sm:$0xff] }
 0x23b   : > { %v813_v27 = vsel %vm746_vm2, %v1919_v24, 0.0 }
 0x23c   : > { %1583 = vpow2.f32 %v783_v26  ;;  %814 = vadd.xlane.f32.xlu2 %v813_v27 }
 0x23d   : > { %1585 = vpow2.f32 %v787_v29 }
 0x240   : > { %v892_v30 = vpop.permute.xlu0 %891 }
 0x241   : > { %1498 = vmatpush.msk.msra.mxu2 %vm841_vm3, %v892_v30 }
 0x242   : > { %v1584_v32 = vpop.eup %1583 }
 0x243   : > { %v801_v34 = vsel %vm746_vm2, %v1584_v32, 0.0  ;;  %v1586_v35 = vpop.eup %1585 }
 0x244   : > { %802 = vadd.xlane.f32.xlu0 %v801_v34  ;;  %v807_v38 = vsel %vm746_vm2, %v1586_v35, 0.0 }
 0x24b   : > { %999 = vrot.lane.b32.xlu1 %v1857_v33, %s1672_s13  ;;  %v776_v33 = vsub.f32 %v1902_v60, %v764_v15 }
 0x24c   : > { %808 = vadd.xlane.f32.xlu0 %v807_v38 }
 0x24d   : > { %v789_v40 = vmul.f32 1.442695, %v776_v33  ;;  %v1574_v33 = vld [vmem:[%s2109_s4] ss:$0 sm:$0xff] }
 0x24f   : > { %1587 = vpow2.f32 %v789_v40 }
 0x253   : > { %835 = vrot.lane.b32.xlu1 %v1837_v22, %s1672_s13 }
 0x254   : > { %918 = vrot.lane.b32.xlu2 %v1855_v31, %s1672_s13  ;;  %v793_v31 = vmul.f32 1.442695, %v778_v42 }
 0x255   : > { %v1588_v41 = vpop.eup %1587 }
 0x256   : > { %v810_v22 = vsel %vm746_vm2, %v1588_v41, 0.0  ;;  %1589 = vpow2.f32 %v793_v31  ;;  %v1264_v31 = vld [vmem:[%s2110_s5 + $0x30] sm:$0xff] }
 0x25b   : > { %864 = vrot.lane.b32.xlu1 %v1848_v28, %s1672_s13 }
 0x25c   : > { %v1590_v43 = vpop.eup %1589 }
 0x25d   : > { %v816_v28 = vsel %vm746_vm2, %v1590_v43, 0.0 }
 0x260   : > { %945 = vrot.lane.b32.xlu0 %v1861_v36, %s1672_s13 }
 0x263   : > { %1026 = vrot.lane.b32.xlu1 %v1863_v37, %s1672_s13 }
 0x278   : > { %v797_v36 = vpop.xlane.xlu1 %796 }
 0x27d   : > { %811 = vadd.xlane.f32.xlu2 %v810_v22  ;;  %v1265_v22 = vld [vmem:[%s2110_s5 + $0x38] sm:$0xff] }
 0x280   : > { %v800_v37 = vpop.xlane.xlu2 %799 }
 0x28d   : > { %817 = vadd.xlane.f32.xlu1 %v816_v28  ;;  %v1262_v28 = vld [vmem:[%s2110_s5 + $0x20] sm:$0xff] }
 0x2a5   : > { %v806_v44 = vpop.xlane.xlu1 %805 }
 0x2a6   : > { %972 = vrot.lane.b32.xlu1 %v1867_v39, %s1672_s13  ;;  %1591 = vrcp.f32 %v806_v44  ;;  %v1319_v44 = vld [vmem:[%s2111_s6 + $0x28] sm:$0xff]  ;;  %s1523_s13 = sshll.u32 %s1461_s28, 2 }
 0x2a7   : > { %s1390_s17 = scalar_lea.hbm %s2112_s7, %s1523_s13 }
 0x2a8   : > { %s1393_s19 = sshll.u32 %s1390_s17, 4  ;;  %s1394_s19 = int_to_ptr.hbm [resolvable:$true] %s1393_s19 }
 0x2a9   : > { %s1621_s21 = sshra.s32 %s1394_s19, 4  ;;  %s1622_s21 = int_to_ptr.hbm [resolvable:$true] %s1621_s21 }
 0x2aa   : > { %s1623_s15 = scalar_lea.hbm %s1622_s21, 8  ;;  %p1628_p2 = scmp.lt.s32.totalorder %s1622_s21, %s2112_s7 }
 0x2ab   : > { %p1624_p13 = scmp.ne.s32.totalorder %s1622_s21, %s1623_s15  ;;  %p1629_p3 = scmp.lt.s32.totalorder %s1627_s23, %s1623_s15 }
 0x2ac   : > { %v1592_v46 = vpop.eup %1591 }
 0x2ad   : > { %v830_v47 = vmul.f32 %v1592_v46, %v1580_v16  ;;  %v1317_v46 = vld [vmem:[%s2111_s6 + $0x18] sm:$0xff]  ;;  %p1625_p0 = pnand %p1624_p13, %p1754_p6  ;;  %p1630_p4 = por %p1629_p3, %p1628_p2 }
 0x2af   : > { %v815_v45 = vpop.xlane.xlu2 %814  ;;  %p1626_p1 = pneg %p1625_p0 }
 0x2b1   : > { %p1631_p5 = pnand %p1630_p4, %p1626_p1 }
 0x2b7   : > { %v803_v48 = vpop.xlane.xlu0 %802  ;;  %v919_v49 = vpop.permute.xlu2 %918 }
 0x2b8   : > { %1593 = vrcp.f32 %v803_v48  ;;  %1500 = vmatpush.msk.msra.mxu3 %vm841_vm3, %v919_v49 }
 0x2b9   : > { %1501 = vmatmul.msk.f32.vlgmr.msra.gmra.mxu3 %vm837_vm4, %v830_v47  ;;  %1595 = vrcp.f32 %v797_v36  ;;  %v1321_v36 = vld [vmem:[%s2111_s6 + $0x38] sm:$0xff]  ;;  %v1316_v47 = vld [vmem:[%s2111_s6 + $0x10] sm:$0xff] }
 0x2ba   : > { %1597 = vrcp.f32 %v815_v45  ;;  %v1318_v45 = vld [vmem:[%s2111_s6 + $0x20] sm:$0xff] }
 0x2bb   : > { %1599 = vrcp.f32 %v800_v37  ;;  %v1320_v37 = vld [vmem:[%s2111_s6 + $0x30] sm:$0xff] }
 0x2bd   : > { %v1000_v50 = vpop.permute.xlu1 %999 }
 0x2be   : > { %v1594_v51 = vpop.eup %1593  ;;  %1506 = vmatpush.msk.msrb.mxu2 %vm841_vm3, %v1000_v50 }
 0x2bf   : > { %v829_v39 = vmul.f32 %v1594_v51, %v1584_v32  ;;  %v1596_v52 = vpop.eup %1595  ;;  %v809_v56 = vpop.xlane.xlu0 %808 }
 0x2c0   : > { %v1598_v53 = vpop.eup %1597  ;;  %v827_v54 = vmul.f32 %v1596_v52, %v1910_v5  ;;  %1601 = vrcp.f32 %v809_v56 }
 0x2c1   : > { %1499 = vmatmul.msk.f32.vlgmr.msra.gmra.mxu2 %vm837_vm4, %v829_v39  ;;  %v833_v57 = vmul.f32 %v1598_v53, %v1919_v24  ;;  %v1600_v58 = vpop.eup %1599  ;;  %v1258_v24 = vld [vmem:[%s2110_s5] sm:$0xff] }
 0x2c2   : > { %v828_v59 = vmul.f32 %v1600_v58, %v1914_v8  ;;  %v349_v8 = vld [vmem:[%s2108_s3 + $0x18] sm:$0xff]  ;;  %1117 = vmatpush.msra.mxu2 %v348_v10 }
 0x2c5   : > { %v836_v55 = vpop.permute.xlu1 %835 }
 0x2c6   : > { %1494 = vmatpush.msk.msra.mxu0 %vm841_vm3, %v836_v55  ;;  %v1602_v61 = vpop.eup %1601 }
 0x2c7   : > { %1495 = vmatmul.msk.f32.vlgmr.msra.gmra.mxu0 %vm837_vm4, %v827_v54  ;;  %v831_v62 = vmul.f32 %v1602_v61, %v1586_v35  ;;  %v1329_v61 = vld [vmem:[%s2111_s6 + $0x78] sm:$0xff] }
 0x2c9   : > { %1507 = vmatmul.msk.f32.vlgmr.msrb.gmra.mxu2 %vm837_vm4, %v833_v57 }
 0x2ca   : > { %1209 = vmatpush.msrb.mxu2 %v348_v10 }
 0x2cd   : > { %v865_v60 = vpop.permute.xlu1 %864 }
 0x2ce   : > { %1496 = vmatpush.msk.msra.mxu1 %vm841_vm3, %v865_v60  ;;  %v1314_v60 = vld [vmem:[%s2111_s6] sm:$0xff] }
 0x2cf   : > { %1497 = vmatmul.msk.f32.vlgmr.msra.gmra.mxu1 %vm837_vm4, %v828_v59  ;;  %v1315_v59 = vld [vmem:[%s2111_s6 + $0x8] sm:$0xff] }
 0x2d2   : > { %v946_v63 = vpop.permute.xlu0 %945 }
 0x2d3   : > { %1502 = vmatpush.msk.msrb.mxu0 %vm841_vm3, %v946_v63  ;;  %v1327_v63 = vld [vmem:[%s2111_s6 + $0x68] sm:$0xff] }
 0x2d4   : > { %1503 = vmatmul.msk.f32.vlgmr.msrb.gmra.mxu0 %vm837_vm4, %v831_v62  ;;  %v1328_v62 = vld [vmem:[%s2111_s6 + $0x70] sm:$0xff] }
 0x2d5   : > { %v1027_v0 = vpop.permute.xlu1 %1026  ;;  %1071 = vmatpush.msra.mxu0 %v346_v9 }
 0x2d6   : > { %1508 = vmatpush.msk.msrb.mxu3 %vm841_vm3, %v1027_v0  ;;  %v1326_v0 = vld [vmem:[%s2111_s6 + $0x60] sm:$0xff] }
 0x2d7   : > { %1163 = vmatpush.msrb.mxu0 %v346_v9 }
 0x2d8   : > { %1140 = vmatpush.msra.mxu3 %v349_v8 }
 0x2f0   : > { %v812_v4 = vpop.xlane.xlu2 %811 }
 0x300   : > { %v818_v1 = vpop.xlane.xlu1 %817 }
 0x301   : > { %1603 = vrcp.f32 %v818_v1  ;;  %v1325_v1 = vld [vmem:[%s2111_s6 + $0x58] sm:$0xff] }
 0x302   : > { %1605 = vrcp.f32 %v812_v4 }
 0x307   : > { %v1604_v2 = vpop.eup %1603 }
 0x308   : > { %v834_v3 = vmul.f32 %v1604_v2, %v1590_v43  ;;  %v1606_v5 = vpop.eup %1605  ;;  %v1263_v43 = vld [vmem:[%s2110_s5 + $0x28] sm:$0xff]  ;;  %v1324_v2 = vld [vmem:[%s2111_s6 + $0x50] sm:$0xff] }
 0x309   : > { %v832_v6 = vmul.f32 %v1606_v5, %v1588_v41  ;;  %v1323_v5 = vld [vmem:[%s2111_s6 + $0x48] sm:$0xff] }
 0x30a   : > { %1509 = vmatmul.msk.f32.vlgmr.msrb.gmra.mxu3 %vm837_vm4, %v834_v3 }
 0x30b   : > { %1232 = vmatpush.msrb.mxu3 %v349_v8 }
 0x318   : > { %v973_v7 = vpop.permute.xlu1 %972 }
 0x319   : > { %1504 = vmatpush.msk.msrb.mxu1 %vm841_vm3, %v973_v7 }
 0x31a   : > { %1505 = vmatmul.msk.f32.vlgmr.msrb.gmra.mxu1 %vm837_vm4, %v832_v6  ;;  %v1322_v6 = vld [vmem:[%s2111_s6 + $0x40] sm:$0xff] }
 0x31b   : > { %1094 = vmatpush.msra.mxu1 %v347_v11 }
 0x31d   : > { %1186 = vmatpush.msrb.mxu1 %v347_v11 }
 0x33c   : > { %v942_v12 = vpop.f32.mrf.mxu3 }
 0x33d   : > { %1513 = vmatmul.msk.f32.vlgmr.msra.gmra.mxu3 %vm532_vm1, %v942_v12 }
 0x33e   : > { %1365 = vmatpush.msra.mxu3 %v1329_v61 }
 0x340   : > { %1366 = vmatpush.msra.mxu3 %v1328_v62 }
 0x342   : > { %1367 = vmatpush.msra.mxu3 %v1327_v63 }
 0x344   : > { %v861_v13 = vpop.f32.mrf.mxu0  ;;  %v915_v14 = vpop.f32.mrf.mxu2  ;;  %1368 = vmatpush.msra.mxu3 %v1326_v0 }
 0x345   : > { %1510 = vmatmul.msk.f32.vlgmr.msra.gmra.mxu0 %vm532_vm1, %v861_v13  ;;  %1512 = vmatmul.msk.f32.vlgmr.msra.gmra.mxu2 %vm532_vm1, %v915_v14 }
 0x346   : > { %1281 = vmatpush.msra.mxu0 %v1261_v20  ;;  %1342 = vmatpush.msra.mxu2 %v1321_v36 }
 0x347   : > { %1369 = vmatpush.msra.mxu3 %v1325_v1 }
 0x348   : > { %1282 = vmatpush.msra.mxu0 %v1260_v21  ;;  %1343 = vmatpush.msra.mxu2 %v1320_v37 }
 0x349   : > { %1370 = vmatpush.msra.mxu3 %v1324_v2 }
 0x34a   : > { %1283 = vmatpush.msra.mxu0 %v1259_v23  ;;  %1344 = vmatpush.msra.mxu2 %v1319_v44 }
 0x34b   : > { %1371 = vmatpush.msra.mxu3 %v1323_v5 }
 0x34c   : > { %v888_v15 = vpop.f32.mrf.mxu1  ;;  %v1023_v16 = vpop.f32.mrf.mxu2  ;;  %1284 = vmatpush.msra.mxu0 %v1258_v24  ;;  %1345 = vmatpush.msra.mxu2 %v1318_v45 }
 0x34d   : > { %1511 = vmatmul.msk.f32.vlgmr.msra.gmra.mxu1 %vm532_vm1, %v888_v15  ;;  %1516 = vmatmul.msk.f32.vlgmr.msrb.gmra.mxu2 %vm532_vm1, %v1023_v16 }
 0x34e   : > { %1304 = vmatpush.msra.mxu1 %v1265_v22  ;;  %1346 = vmatpush.msra.mxu2 %v1317_v46 }
 0x34f   : > { %1372 = vmatpush.msra.mxu3 %v1322_v6 }
 0x350   : > { %1305 = vmatpush.msra.mxu1 %v1264_v31  ;;  %1347 = vmatpush.msra.mxu2 %v1316_v47 }
 0x351   : > { %v969_v17 = vpop.f32.mrf.mxu0 }
 0x352   : > { %1514 = vmatmul.msk.f32.vlgmr.msrb.gmra.mxu0 %vm532_vm1, %v969_v17  ;;  %1306 = vmatpush.msra.mxu1 %v1263_v43 }
 0x353   : > { %1348 = vmatpush.msra.mxu2 %v1315_v59 }
 0x354   : > { %1307 = vmatpush.msra.mxu1 %v1262_v28 }
 0x355   : > { %1349 = vmatpush.msra.mxu2 %v1314_v60 }
 0x38d   : > { %v1050_v18 = vpop.f32.mrf.mxu3 }
 0x38e   : > { %1517 = vmatmul.msk.f32.vlgmr.msrb.gmra.mxu3 %vm532_vm1, %v1050_v18 }
 0x397   : > { %v996_v19 = vpop.f32.mrf.mxu1 }
 0x398   : > { %1515 = vmatmul.msk.f32.vlgmr.msrb.gmra.mxu1 %vm532_vm1, %v996_v19 }
 0x3c0   : > { %v1142_v32 = vpop.f32.mrf.mxu3 }
 0x3c1   : > { %v1243_v40 = vsel %vm1237_vm5, %v1142_v32, 0.0 }
 0x3c2   : > { %v1073_v25 = vpop.f32.mrf.mxu0 }
 0x3c3   : > { %v1238_v29 = vsel %vm1237_vm5, %v1073_v25, 0.0 }
 0x3c8   : > { %v1119_v26 = vpop.f32.mrf.mxu2 }
 0x3c9   : > { %v1241_v35 = vsel %vm1237_vm5, %v1119_v26, 0.0 }
 0x3ca   : > { %v1096_v27 = vpop.f32.mrf.mxu1 }
 0x3cb   : > { %v1239_v30 = vsel %vm1237_vm5, %v1096_v27, 0.0 }
 0x3cc   : > { %v1240_v34 = vadd.f32 %v1239_v30, %v1238_v29 }
 0x3ce   : > { %v1242_v38 = vadd.f32 %v1241_v35, %v1240_v34 }
 0x3cf   : > { %v1165_v48 = vpop.f32.mrf.mxu0 }
 0x3d0   : > { %v1244_v41 = vadd.f32 %v1243_v40, %v1242_v38  ;;  %v1211_v49 = vpop.f32.mrf.mxu2  ;;  %v1245_v51 = vsel %vm1237_vm5, %v1165_v48, 0.0 }
 0x3d1   : > { %v1248_v54 = vsel %vm1237_vm5, %v1211_v49, 0.0 }
 0x3d2   : > { %v1256_v42 = vadd.f32 %v1574_v33, %v1244_v41 }
 0x3d4   : > { %1518 = vmatmul.msk.f32.vlgmr.msra.gmra.mxu0 %vm362_vm0, %v1256_v42 }
 0x411   : > { %v1234_v52 = vpop.f32.mrf.mxu3 }
 0x412   : > { %v1250_v56 = vsel %vm1237_vm5, %v1234_v52, 0.0 }
 0x415   : > { %v1188_v50 = vpop.f32.mrf.mxu1 }
 0x416   : > { %v1246_v39 = vsel %vm1237_vm5, %v1188_v50, 0.0 }
 0x417   : > { %v1247_v53 = vadd.f32 %v1246_v39, %v1245_v51 }
 0x419   : > { %v1249_v55 = vadd.f32 %v1248_v54, %v1247_v53 }
 0x41b   : > { %v1251_v57 = vadd.f32 %v1250_v56, %v1249_v55 }
 0x41d   : > { %v1257_v58 = vadd.f32 %v1574_v33, %v1251_v57 }
 0x41f   : > { %1519 = vmatmul.msk.f32.vlgmr.msra.gmra.mxu1 %vm362_vm0, %v1257_v58 }
 0x451   : > { %v1286_v3 = vpop.f32.mrf.mxu0 }
 0x452   : > { %v1312_v4 = vmax.f32 %v1286_v3, 0.0 }
 0x454   : > { %1520 = vmatmul.msk.f32.vlgmr.msra.gmra.mxu2 %vm1330_vm6, %v1312_v4 }
 0x49c   : > { %v1309_v7 = vpop.f32.mrf.mxu1 }
 0x49d   : > { %v1313_v8 = vmax.f32 %v1309_v7, 0.0 }
 0x49f   : > { %1521 = vmatmul.msk.f32.vlgmr.msra.gmra.mxu3 %vm1330_vm6, %v1313_v8 }
 0x4d7   : > { %v1351_v9 = vpop.f32.mrf.mxu2 }
 0x4d8   : > { %1377 = vst.msk [vmem:[%s323_s8] sm:$0xf] %vm1237_vm5, %v1351_v9 }
 0x522   : > { %v1374_v10 = vpop.f32.mrf.mxu3 }
 0x523   : > { %1378 = vst.msk [vmem:[%s323_s8 + $0x4] sm:$0xf] %vm1237_vm5, %v1374_v10 }
 0x524   : > { %1634 = shalt.err (!%p1631_p5)
}
 0x525   : > { %s1673_s9 = smov 64   ;;  %s1674_s8 = smov 128  }
 0x526   : > { %s1675_s14 = smov 4  }
 0x527   : > { %1526 = dma.vmem_to_hbm [thread:$0]  (%p1754_p6), %s1392_s18, 128, %s1394_s19, %s1380_s20, %s1673_s9, %s1674_s8, %s1675_s14  }
 0x528 PF: > { %s1408_s16 = sand.u32 1, %s1657_s24   ;;  %p1529_p7 = pnand %p1464_p9, %p1758_p8 }
 0x529   : > { %s1409_s17 = scalar_lea.sflag [#allocation4], %s1408_s16 }
 0x52a   : > { %p1530_p10 = pneg %p1529_p7 }
 0x52c   : > { %1652 = dma.done.wait (%p1530_p10), %s1409_s17, 128  }
 0x52d   : > { %1654 = vsyncadd (%p1530_p10), %s1409_s17, 4294967168  ;;  %p17_p11 = scmp.ge.s32.totalorder %s1739_s30, 4   ;;  %s2115_s24 = smov %s1661_s25 }
 0x52e   : > { %s2116_s25 = smov %s1665_s26  ;;  %s2117_s26 = smov %s1752_s10 }
 0x52f   : > { %s2118_s27 = smov %s1739_s30  ;;  %19 = sbr.rel (!%p17_p11) target bundleno = 3 (0x3), region = 129 }
 0x534   :  { %1415 = vsyncpa [#allocation4], 1 }
 0x535   :  { %1417 = vsyncpa [#allocation4 + $0x1], 1 }

// kernel: simple_transformer_moe_forward.2
= control target key start
LH: loop header
LB: loop body
LE: loop exit
PB: predicated region body
PF: predicated region fallthrough
CT: control target
= control target key end

     0   :  { %s1679_s24 = smov 0   ;;  %s1681_s25 = smov 0   ;;  %s2034_s0 = inlined_call_operand.vmem [shape: f32[2,2,4,32], index: 0, kind: input, shape index: {}]   ;;  %s2035_s1 = inlined_call_operand.vmem [shape: f32[4,32,24], index: 1, kind: input, shape index: {}]   ;;  %s2036_s2 = inlined_call_operand.vmem [shape: f32[4,1,24], index: 2, kind: input, shape index: {}]   ;;  %s2037_s3 = inlined_call_operand.vmem [shape: f32[4,8,32], index: 3, kind: input, shape index: {}]   ;;  %s2038_s4 = inlined_call_operand.vmem [shape: f32[1,32], index: 4, kind: input, shape index: {}]   ;;  %s2039_s5 = inlined_call_operand.vmem [shape: f32[2,32,64], index: 5, kind: input, shape index: {}]   ;;  %s2040_s6 = inlined_call_operand.vmem [shape: f32[2,64,32], index: 6, kind: input, shape index: {}]   ;;  %s2041_s7 = inlined_call_operand.vmem [shape: f32[2,2,4,32], index: 7, kind: output, shape index: {}]  }
   0x1   :  { %s1683_s26 = smov 0  }
   0x2 LB: > { %s1485_s27 = sadd.s32 4294967295, %s1635_s26   ;;  %s1696_s28 = sadd.s32 1, %s1635_s26   ;;  %s1635_s26 = sphi %s1683_s26, %s2045_s26   ;;  %s1631_s25 = sphi %s1681_s25, %s2044_s25   ;;  %s1627_s24 = sphi %s1679_s24, %s2043_s24  }
   0x3   : > { %s21_s29 = ssub.s32 %s1635_s26, %s1696_s28  ;;  %s24_s30 = sadd.s32 1, %s1631_s25 }
   0x4   : > { %p22_p0 = scmp.eq.s32.totalorder %s21_s29, 0  ;;  %p31_p1 = scmp.ne.s32.totalorder %s1631_s25, %s1627_s24 }
   0x5   : > { %p32_p2 = scmp.eq.s32.totalorder %s1635_s26, 0  ;;  %p187_p3 = scmp.eq.s32.totalorder %s1485_s27, 1 }
   0x6   : > { %s1707_s8 = scalar_select %p22_p0, %s1631_s25, %s24_s30  }
   0x7   : > { %p33_p4 = por %p32_p2, %p31_p1  ;;  %p1709_p5 = por %p187_p3, %p31_p1 }
   0x8   : > { %p1488_p6 = scmp.ge.s32.totalorder %s1635_s26, 2 }
   0xa   : > { %227 = sbr.rel (%p1488_p6) target bundleno = 21 (0x15), region = 40 }
   0xf   : > { %230 = sbr.rel (!%p33_p4) target bundleno = 21 (0x15), region = 44  ;;  %s232_s10 = sand.u32 (%p33_p4), 1, %s1631_s25  }
  0x10   : > { %s1490_s11 = sshll.u32 (%p33_p4), %s1635_s26, 2  ;;  %s1489_s12 = sshll.u32 (%p33_p4), %s232_s10, 3 }
  0x11   : > { %s236_s15 = scalar_lea.vmem (%p33_p4), %s2034_s0, %s1490_s11  ;;  %s234_s16 = scalar_lea.vmem (%p33_p4), [#allocation2], %s1489_s12 }
  0x12   : > { %v253_v0 = vld [vmem:[%s236_s15] sm:$0xf] (%p33_p4)  ;;  %v255_v1 = vld [vmem:[%s236_s15 + $0x8] sm:$0xf] (%p33_p4) }
  0x13   : > { %254 = vst [vmem:[%s234_s16] sm:$0xf] (%p33_p4), %v253_v0 }
  0x14   : > { %256 = vst [vmem:[%s234_s16 + $0x4] sm:$0xf] %v255_v1 }
  0x15 PF: > { %p1491_p7 = scmp.ge.s32.totalorder %s1635_s26, 1  ;;  %p283_p8 = scmp.lt.s32.totalorder %s1635_s26, 3 }
  0x17   : > { %p284_p9 = pnand %p1491_p7, %p283_p8 }
  0x18   : > { %s290_s23 = sand.u32 (!%p284_p9), 1, %s1627_s24   ;;  %s1637_s21 = smov (!%p284_p9), 120  }
  0x19   : > { %287 = sbr.rel (%p284_p9) target bundleno = 1322 (0x52a), region = 85  ;;  %s1734_s10 = sshll.u32 (!%p284_p9), %s290_s23, 3 }
  0x1a   : > { %s292_s11 = scalar_lea.vmem (!%p284_p9), [#allocation2], %s1734_s10  ;;  %s1638_s13 = smov (!%p284_p9), 112  }
  0x1b   : > { %s319_s23 = scalar_lea.vmem (!%p284_p9), [#allocation3], %s1734_s10 }
  0x1e   : > { %v325_v2 = vld [vmem:[%s2035_s1 + $0x18] sm:$0xff]  ;;  %v324_v4 = vld [vmem:[%s2035_s1 + $0x10] sm:$0xff]  ;;  %v323_v6 = vld [vmem:[%s2035_s1 + $0x8] sm:$0xff]  ;;  %vm358_vm0 = vcmask 261120   ;;  %vm528_vm1 = vcmask 64512   ;;  %vm742_vm2 = vcmask 27648  }
  0x1f   : > { %v333_v3 = vld [vmem:[%s2035_s1 + $0x58] sm:$0xff]  ;;  %374 = vmatpush.msra.mxu0 %v325_v2  ;;  %v332_v5 = vld [vmem:[%s2035_s1 + $0x50] sm:$0xff]  ;;  %v331_v7 = vld [vmem:[%s2035_s1 + $0x48] sm:$0xff]  ;;  %vm837_vm3 = vcmask 1043456   ;;  %vm833_vm4 = vcmask 31744   ;;  %vm1233_vm5 = vcmask 257024  }
  0x20   : > { %414 = vmatpush.msra.mxu2 %v333_v3  ;;  %v329_v8 = vld [vmem:[%s2035_s1 + $0x38] sm:$0xff]  ;;  %v328_v10 = vld [vmem:[%s2035_s1 + $0x30] sm:$0xff]  ;;  %v322_v11 = vld [vmem:[%s2035_s1] sm:$0xff]  ;;  %vm1326_vm6 = vcmask 523264   ;;  %s1547_s29 = sshll.u32 (%p1709_p5), %s1485_s27, 2 }
  0x21   : > { %375 = vmatpush.msra.mxu0 %v324_v4  ;;  %v337_v9 = vld [vmem:[%s2035_s1 + $0x78] sm:$0xff]  ;;  %v330_v12 = vld [vmem:[%s2035_s1 + $0x40] sm:$0xff]  ;;  %394 = vmatpush.msra.mxu1 %v329_v8  ;;  %v336_v13 = vld [vmem:[%s2035_s1 + $0x70] sm:$0xff]  ;;  %s1383_s12 = scalar_lea.vmem (%p1709_p5), %s2041_s7, %s1547_s29 }
  0x22   : > { %415 = vmatpush.msra.mxu2 %v332_v5  ;;  %434 = vmatpush.msra.mxu3 %v337_v9  ;;  %v320_v14 = vld [vmem:[%s292_s11] sm:$0xf]  ;;  %v321_v19 = vld [vmem:[%s292_s11 + $0x4] sm:$0xf] }
  0x23   : > { %376 = vmatpush.msra.mxu0 %v323_v6  ;;  %395 = vmatpush.msra.mxu1 %v328_v10  ;;  %v327_v15 = vld [vmem:[%s2035_s1 + $0x28] sm:$0xff]  ;;  %v326_v17 = vld [vmem:[%s2035_s1 + $0x20] sm:$0xff] }
  0x24   : > { %416 = vmatpush.msra.mxu2 %v331_v7  ;;  %435 = vmatpush.msra.mxu3 %v336_v13  ;;  %v335_v16 = vld [vmem:[%s2035_s1 + $0x68] sm:$0xff]  ;;  %v334_v18 = vld [vmem:[%s2035_s1 + $0x60] sm:$0xff] }
  0x25   : > { %377 = vmatpush.msra.mxu0 %v322_v11  ;;  %396 = vmatpush.msra.mxu1 %v327_v15  ;;  %v1576_v20 = vld [vmem:[%s2036_s2] ss:$0 sm:$0xff]  ;;  %v1577_v23 = vld [vmem:[%s2036_s2 + $0x2] ss:$0 sm:$0xff]  ;;  %v1578_v24 = vld [vmem:[%s2036_s2 + $0x1] ss:$0 sm:$0xff] }
  0x26   : > { %417 = vmatpush.msra.mxu2 %v330_v12  ;;  %1494 = vmatmul.msk.f32.vlgmr.msra.gmra.mxu0 %vm358_vm0, %v320_v14  ;;  %v1579_v29 = vld [vmem:[%s2036_s2 + $0x3] ss:$0 sm:$0xff] }
  0x27   : > { %1496 = vmatmul.msk.f32.vlgmr.msra.gmra.mxu2 %vm358_vm0, %v320_v14  ;;  %436 = vmatpush.msra.mxu3 %v335_v16 }
  0x28   : > { %497 = vmatpush.msrb.mxu2 %v333_v3  ;;  %457 = vmatpush.msrb.mxu0 %v325_v2 }
  0x29   : > { %397 = vmatpush.msra.mxu1 %v326_v17  ;;  %437 = vmatpush.msra.mxu3 %v334_v18 }
  0x2a   : > { %498 = vmatpush.msrb.mxu2 %v332_v5  ;;  %1495 = vmatmul.msk.f32.vlgmr.msra.gmra.mxu1 %vm358_vm0, %v320_v14 }
  0x2b   : > { %1497 = vmatmul.msk.f32.vlgmr.msra.gmra.mxu3 %vm358_vm0, %v320_v14  ;;  %458 = vmatpush.msrb.mxu0 %v324_v4 }
  0x2c   : > { %499 = vmatpush.msrb.mxu2 %v331_v7  ;;  %517 = vmatpush.msrb.mxu3 %v337_v9 }
  0x2d   : > { %477 = vmatpush.msrb.mxu1 %v329_v8  ;;  %459 = vmatpush.msrb.mxu0 %v323_v6 }
  0x2e   : > { %500 = vmatpush.msrb.mxu2 %v330_v12  ;;  %518 = vmatpush.msrb.mxu3 %v336_v13 }
  0x2f   : > { %1500 = vmatmul.msk.f32.vlgmr.msrb.gmra.mxu2 %vm358_vm0, %v321_v19  ;;  %478 = vmatpush.msrb.mxu1 %v328_v10 }
  0x30   : > { %519 = vmatpush.msrb.mxu3 %v335_v16  ;;  %460 = vmatpush.msrb.mxu0 %v322_v11 }
  0x31   : > { %479 = vmatpush.msrb.mxu1 %v327_v15  ;;  %1498 = vmatmul.msk.f32.vlgmr.msrb.gmra.mxu0 %vm358_vm0, %v321_v19 }
  0x32   : > { %520 = vmatpush.msrb.mxu3 %v334_v18 }
  0x33   : > { %1501 = vmatmul.msk.f32.vlgmr.msrb.gmra.mxu3 %vm358_vm0, %v321_v19  ;;  %480 = vmatpush.msrb.mxu1 %v326_v17 }
  0x34   : > { %1499 = vmatmul.msk.f32.vlgmr.msrb.gmra.mxu1 %vm358_vm0, %v321_v19 }
  0xa3   : > { %v379_v21 = vpop.f32.mrf.mxu0 }
  0xa4   : > { %v1784_v22 = vadd.f32 %v1576_v20, %v379_v21 }
  0xa6   : > { %526 = vrot.lane.b32.xlu2 %v1784_v22, %s1637_s21 }
  0xa7   : > { %v399_v25 = vpop.f32.mrf.mxu1 }
  0xa8   : > { %v1795_v28 = vadd.f32 %v1578_v24, %v399_v25 }
  0xaa   : > { %v419_v26 = vpop.f32.mrf.mxu2 }
  0xab   : > { %v1793_v27 = vadd.f32 %v1577_v23, %v419_v26 }
  0xad   : > { %581 = vrot.lane.b32.xlu0 %v1793_v27, %s1637_s21 }
  0xae   : > { %554 = vrot.lane.b32.xlu2 %v1795_v28, %s1637_s21  ;;  %v439_v30 = vpop.f32.mrf.mxu3  ;;  %v462_v34 = vpop.f32.mrf.mxu0 }
  0xaf   : > { %v1802_v31 = vadd.f32 %v1579_v29, %v439_v30  ;;  %v1808_v36 = vadd.f32 %v1576_v20, %v462_v34 }
  0xb1   : > { %v482_v38 = vpop.f32.mrf.mxu1 }
  0xb2   : > { %v502_v32 = vpop.f32.mrf.mxu2  ;;  %v1814_v39 = vadd.f32 %v1578_v24, %v482_v38 }
  0xb3   : > { %v1804_v33 = vadd.f32 %v1577_v23, %v502_v32 }
  0xb5   : > { %689 = vrot.lane.b32.xlu1 %v1804_v33, %s1637_s21  ;;  %608 = vrot.lane.b32.xlu0 %v1802_v31, %s1637_s21 }
  0xb6   : > { %v522_v35 = vpop.f32.mrf.mxu3 }
  0xb7   : > { %v1810_v37 = vadd.f32 %v1579_v29, %v522_v35 }
  0xbd   : > { %716 = vrot.lane.b32.xlu1 %v1810_v37, %s1637_s21  ;;  %635 = vrot.lane.b32.xlu0 %v1808_v36, %s1637_s21 }
  0xc5   : > { %662 = vrot.lane.b32.xlu1 %v1814_v39, %s1637_s21 }
 0x100   : > { %v527_v40 = vpop.permute.xlu2 %526 }
 0x101   : > { %1502 = vmatpush.xpose.msk.msra.mxu0 %vm528_vm1, %v527_v40 }
 0x104   : > { %1503 = vmatmul.msk.f32.vlgmr.msra.gmra.mxu0 %vm528_vm1, %v1784_v22 }
 0x108   : > { %v555_v41 = vpop.permute.xlu2 %554 }
 0x109   : > { %1504 = vmatpush.xpose.msk.msra.mxu1 %vm528_vm1, %v555_v41 }
 0x10c   : > { %1505 = vmatmul.msk.f32.vlgmr.msra.gmra.mxu1 %vm528_vm1, %v1795_v28 }
 0x11f   : > { %v582_v42 = vpop.permute.xlu0 %581 }
 0x120   : > { %1506 = vmatpush.xpose.msk.msra.mxu2 %vm528_vm1, %v582_v42 }
 0x123   : > { %1507 = vmatmul.msk.f32.vlgmr.msra.gmra.mxu2 %vm528_vm1, %v1793_v27 }
 0x127   : > { %v690_v43 = vpop.permute.xlu1 %689  ;;  %v609_v44 = vpop.permute.xlu0 %608 }
 0x128   : > { %1508 = vmatpush.xpose.msk.msra.mxu3 %vm528_vm1, %v609_v44  ;;  %1514 = vmatpush.xpose.msk.msrb.mxu2 %vm528_vm1, %v690_v43 }
 0x12b   : > { %1509 = vmatmul.msk.f32.vlgmr.msra.gmra.mxu3 %vm528_vm1, %v1802_v31  ;;  %1515 = vmatmul.msk.f32.vlgmr.msrb.gmra.mxu2 %vm528_vm1, %v1804_v33 }
 0x12f   : > { %v717_v45 = vpop.permute.xlu1 %716  ;;  %v636_v46 = vpop.permute.xlu0 %635 }
 0x130   : > { %1510 = vmatpush.xpose.msk.msrb.mxu0 %vm528_vm1, %v636_v46  ;;  %1516 = vmatpush.xpose.msk.msrb.mxu3 %vm528_vm1, %v717_v45 }
 0x133   : > { %1511 = vmatmul.msk.f32.vlgmr.msrb.gmra.mxu0 %vm528_vm1, %v1808_v36  ;;  %1517 = vmatmul.msk.f32.vlgmr.msrb.gmra.mxu3 %vm528_vm1, %v1810_v37 }
 0x137   : > { %v663_v47 = vpop.permute.xlu1 %662 }
 0x138   : > { %1512 = vmatpush.xpose.msk.msrb.mxu1 %vm528_vm1, %v663_v47 }
 0x13b   : > { %1513 = vmatmul.msk.f32.vlgmr.msrb.gmra.mxu1 %vm528_vm1, %v1814_v39 }
 0x181   : > { %v550_v48 = vpop.f32.mrf.mxu0 }
 0x182   : > { %v743_v49 = vsel %vm742_vm2, %v550_v48, -inf }
 0x183   : > { %744 = vmax.xlane.f32.xlu2 %v743_v49 }
 0x189   : > { %v577_v50 = vpop.f32.mrf.mxu1 }
 0x18a   : > { %v746_v51 = vsel %vm742_vm2, %v577_v50, -inf }
 0x18b   : > { %747 = vmax.xlane.f32.xlu2 %v746_v51 }
 0x1a6   : > { %v604_v52 = vpop.f32.mrf.mxu2 }
 0x1a7   : > { %v749_v63 = vsel %vm742_vm2, %v604_v52, -inf }
 0x1ae   : > { %v631_v53 = vpop.f32.mrf.mxu3  ;;  %v712_v57 = vpop.f32.mrf.mxu2 }
 0x1af   : > { %v752_v54 = vsel %vm742_vm2, %v631_v53, -inf  ;;  %v761_v61 = vsel %vm742_vm2, %v712_v57, -inf }
 0x1b0   : > { %753 = vmax.xlane.f32.xlu0 %v752_v54  ;;  %v658_v55 = vpop.f32.mrf.mxu0 }
 0x1b1   : > { %v755_v56 = vsel %vm742_vm2, %v658_v55, -inf }
 0x1b2   : > { %756 = vmax.xlane.f32.xlu1 %v755_v56 }
 0x1b6   : > { %v1845_v58 = vpop.f32.mrf.mxu3 }
 0x1b7   : > { %v764_v59 = vsel %vm742_vm2, %v1845_v58, -inf }
 0x1b8   : > { %765 = vmax.xlane.f32.xlu0 %v764_v59  ;;  %v1849_v60 = vpop.f32.mrf.mxu1 }
 0x1b9   : > { %v758_v62 = vsel %vm742_vm2, %v1849_v60, -inf }
 0x1ba   : > { %762 = vmax.xlane.f32.xlu1 %v761_v61  ;;  %759 = vmax.xlane.f32.xlu2 %v758_v62 }
 0x1c2   : > { %750 = vmax.xlane.f32.xlu2 %v749_v63 }
 0x1cc   : > { %887 = vrot.lane.b32.xlu0 %v1793_v27, %s1638_s13 }
 0x1f6   : > { %v745_v0 = vpop.xlane.xlu2 %744 }
 0x1f7   : > { %v767_v1 = vsub.f32 %v550_v48, %v745_v0 }
 0x1f9   : > { %v775_v2 = vmul.f32 1.442695, %v767_v1 }
 0x1fb   : > { %1581 = vpow2.f32 %v775_v2 }
 0x1fe   : > { %v748_v3 = vpop.xlane.xlu2 %747 }
 0x1ff   : > { %v768_v4 = vsub.f32 %v577_v50, %v748_v3 }
 0x201   : > { %v1857_v5 = vpop.eup %1581  ;;  %v777_v6 = vmul.f32 1.442695, %v768_v4 }
 0x202   : > { %v791_v7 = vsel %vm742_vm2, %v1857_v5, 0.0 }
 0x203   : > { %1583 = vpow2.f32 %v777_v6  ;;  %792 = vadd.xlane.f32.xlu1 %v791_v7 }
 0x209   : > { %v1861_v8 = vpop.eup %1583 }
 0x20a   : > { %v794_v9 = vsel %vm742_vm2, %v1861_v8, 0.0 }
 0x20b   : > { %795 = vadd.xlane.f32.xlu2 %v794_v9  ;;  %v342_v9 = vld [vmem:[%s2037_s3] sm:$0xff] }
 0x223   : > { %v754_v10 = vpop.xlane.xlu0 %753 }
 0x224   : > { %v770_v11 = vsub.f32 %v631_v53, %v754_v10  ;;  %v344_v10 = vld [vmem:[%s2037_s3 + $0x10] sm:$0xff] }
 0x225   : > { %v757_v12 = vpop.xlane.xlu1 %756 }
 0x226   : > { %v781_v13 = vmul.f32 1.442695, %v770_v11  ;;  %v771_v25 = vsub.f32 %v658_v55, %v757_v12  ;;  %v343_v11 = vld [vmem:[%s2037_s3 + $0x8] sm:$0xff] }
 0x228   : > { %1585 = vpow2.f32 %v781_v13  ;;  %v783_v29 = vmul.f32 1.442695, %v771_v25 }
 0x22b   : > { %v766_v21 = vpop.xlane.xlu0 %765 }
 0x22c   : > { %v774_v42 = vsub.f32 %v1845_v58, %v766_v21  ;;  %v1256_v21 = vld [vmem:[%s2039_s5 + $0x10] sm:$0xff] }
 0x22d   : > { %v763_v14 = vpop.xlane.xlu1 %762  ;;  %v760_v15 = vpop.xlane.xlu2 %759 }
 0x22e   : > { %v1586_v16 = vpop.eup %1585  ;;  %v773_v17 = vsub.f32 %v712_v57, %v763_v14 }
 0x22f   : > { %v800_v18 = vsel %vm742_vm2, %v1586_v16, 0.0 }
 0x230   : > { %v787_v19 = vmul.f32 1.442695, %v773_v17  ;;  %801 = vadd.xlane.f32.xlu1 %v800_v18 }
 0x232   : > { %1587 = vpow2.f32 %v787_v19 }
 0x235   : > { %v751_v20 = vpop.xlane.xlu2 %750 }
 0x236   : > { %v769_v23 = vsub.f32 %v604_v52, %v751_v20  ;;  %v1257_v20 = vld [vmem:[%s2039_s5 + $0x18] sm:$0xff] }
 0x238   : > { %v1866_v24 = vpop.eup %1587  ;;  %v779_v26 = vmul.f32 1.442695, %v769_v23  ;;  %v1255_v23 = vld [vmem:[%s2039_s5 + $0x8] sm:$0xff] }
 0x239   : > { %v809_v27 = vsel %vm742_vm2, %v1866_v24, 0.0 }
 0x23a   : > { %1589 = vpow2.f32 %v779_v26  ;;  %810 = vadd.xlane.f32.xlu2 %v809_v27 }
 0x23b   : > { %1591 = vpow2.f32 %v783_v29 }
 0x23e   : > { %v888_v30 = vpop.permute.xlu0 %887 }
 0x23f   : > { %1522 = vmatpush.msk.msra.mxu2 %vm837_vm3, %v888_v30 }
 0x240   : > { %v1590_v32 = vpop.eup %1589 }
 0x241   : > { %v797_v34 = vsel %vm742_vm2, %v1590_v32, 0.0  ;;  %v1592_v35 = vpop.eup %1591 }
 0x242   : > { %798 = vadd.xlane.f32.xlu0 %v797_v34  ;;  %v803_v38 = vsel %vm742_vm2, %v1592_v35, 0.0 }
 0x249   : > { %995 = vrot.lane.b32.xlu1 %v1804_v33, %s1638_s13  ;;  %v772_v33 = vsub.f32 %v1849_v60, %v760_v15 }
 0x24a   : > { %804 = vadd.xlane.f32.xlu0 %v803_v38 }
 0x24b   : > { %v785_v40 = vmul.f32 1.442695, %v772_v33  ;;  %v1580_v33 = vld [vmem:[%s2038_s4] ss:$0 sm:$0xff] }
 0x24d   : > { %1593 = vpow2.f32 %v785_v40 }
 0x251   : > { %831 = vrot.lane.b32.xlu1 %v1784_v22, %s1638_s13 }
 0x252   : > { %914 = vrot.lane.b32.xlu2 %v1802_v31, %s1638_s13  ;;  %v789_v31 = vmul.f32 1.442695, %v774_v42 }
 0x253   : > { %v1594_v41 = vpop.eup %1593 }
 0x254   : > { %v806_v22 = vsel %vm742_vm2, %v1594_v41, 0.0  ;;  %1595 = vpow2.f32 %v789_v31  ;;  %v1260_v31 = vld [vmem:[%s2039_s5 + $0x30] sm:$0xff] }
 0x259   : > { %860 = vrot.lane.b32.xlu1 %v1795_v28, %s1638_s13 }
 0x25a   : > { %v1596_v43 = vpop.eup %1595 }
 0x25b   : > { %v812_v28 = vsel %vm742_vm2, %v1596_v43, 0.0 }
 0x25e   : > { %941 = vrot.lane.b32.xlu0 %v1808_v36, %s1638_s13 }
 0x261   : > { %1022 = vrot.lane.b32.xlu1 %v1810_v37, %s1638_s13 }
 0x276   : > { %v793_v36 = vpop.xlane.xlu1 %792 }
 0x27b   : > { %807 = vadd.xlane.f32.xlu2 %v806_v22  ;;  %v1261_v22 = vld [vmem:[%s2039_s5 + $0x38] sm:$0xff] }
 0x27e   : > { %v796_v37 = vpop.xlane.xlu2 %795 }
 0x28b   : > { %813 = vadd.xlane.f32.xlu1 %v812_v28  ;;  %v1258_v28 = vld [vmem:[%s2039_s5 + $0x20] sm:$0xff] }
 0x2a3   : > { %v802_v44 = vpop.xlane.xlu1 %801 }
 0x2a4   : > { %968 = vrot.lane.b32.xlu1 %v1814_v39, %s1638_s13  ;;  %1597 = vrcp.f32 %v802_v44  ;;  %v1315_v44 = vld [vmem:[%s2040_s6 + $0x28] sm:$0xff] }
 0x2aa   : > { %v1598_v46 = vpop.eup %1597 }
 0x2ab   : > { %v826_v47 = vmul.f32 %v1598_v46, %v1586_v16  ;;  %v1313_v46 = vld [vmem:[%s2040_s6 + $0x18] sm:$0xff] }
 0x2ad   : > { %v811_v45 = vpop.xlane.xlu2 %810 }
 0x2b5   : > { %v799_v48 = vpop.xlane.xlu0 %798  ;;  %v915_v49 = vpop.permute.xlu2 %914 }
 0x2b6   : > { %1599 = vrcp.f32 %v799_v48  ;;  %1524 = vmatpush.msk.msra.mxu3 %vm837_vm3, %v915_v49 }
 0x2b7   : > { %1525 = vmatmul.msk.f32.vlgmr.msra.gmra.mxu3 %vm833_vm4, %v826_v47  ;;  %1601 = vrcp.f32 %v793_v36  ;;  %v1317_v36 = vld [vmem:[%s2040_s6 + $0x38] sm:$0xff]  ;;  %v1312_v47 = vld [vmem:[%s2040_s6 + $0x10] sm:$0xff] }
 0x2b8   : > { %1603 = vrcp.f32 %v811_v45  ;;  %v1314_v45 = vld [vmem:[%s2040_s6 + $0x20] sm:$0xff] }
 0x2b9   : > { %1605 = vrcp.f32 %v796_v37  ;;  %v1316_v37 = vld [vmem:[%s2040_s6 + $0x30] sm:$0xff] }
 0x2bb   : > { %v996_v50 = vpop.permute.xlu1 %995 }
 0x2bc   : > { %v1600_v51 = vpop.eup %1599  ;;  %1530 = vmatpush.msk.msrb.mxu2 %vm837_vm3, %v996_v50 }
 0x2bd   : > { %v825_v39 = vmul.f32 %v1600_v51, %v1590_v32  ;;  %v1602_v52 = vpop.eup %1601  ;;  %v805_v56 = vpop.xlane.xlu0 %804 }
 0x2be   : > { %v1604_v53 = vpop.eup %1603  ;;  %v823_v54 = vmul.f32 %v1602_v52, %v1857_v5  ;;  %1607 = vrcp.f32 %v805_v56 }
 0x2bf   : > { %1523 = vmatmul.msk.f32.vlgmr.msra.gmra.mxu2 %vm833_vm4, %v825_v39  ;;  %v829_v57 = vmul.f32 %v1604_v53, %v1866_v24  ;;  %v1606_v58 = vpop.eup %1605  ;;  %v1254_v24 = vld [vmem:[%s2039_s5] sm:$0xff] }
 0x2c0   : > { %v824_v59 = vmul.f32 %v1606_v58, %v1861_v8  ;;  %v345_v8 = vld [vmem:[%s2037_s3 + $0x18] sm:$0xff]  ;;  %1113 = vmatpush.msra.mxu2 %v344_v10 }
 0x2c3   : > { %v832_v55 = vpop.permute.xlu1 %831 }
 0x2c4   : > { %1518 = vmatpush.msk.msra.mxu0 %vm837_vm3, %v832_v55  ;;  %v1608_v61 = vpop.eup %1607 }
 0x2c5   : > { %1519 = vmatmul.msk.f32.vlgmr.msra.gmra.mxu0 %vm833_vm4, %v823_v54  ;;  %v827_v62 = vmul.f32 %v1608_v61, %v1592_v35  ;;  %v1325_v61 = vld [vmem:[%s2040_s6 + $0x78] sm:$0xff] }
 0x2c7   : > { %1531 = vmatmul.msk.f32.vlgmr.msrb.gmra.mxu2 %vm833_vm4, %v829_v57 }
 0x2c8   : > { %1205 = vmatpush.msrb.mxu2 %v344_v10 }
 0x2cb   : > { %v861_v60 = vpop.permute.xlu1 %860 }
 0x2cc   : > { %1520 = vmatpush.msk.msra.mxu1 %vm837_vm3, %v861_v60  ;;  %v1310_v60 = vld [vmem:[%s2040_s6] sm:$0xff] }
 0x2cd   : > { %1521 = vmatmul.msk.f32.vlgmr.msra.gmra.mxu1 %vm833_vm4, %v824_v59  ;;  %v1311_v59 = vld [vmem:[%s2040_s6 + $0x8] sm:$0xff] }
 0x2d0   : > { %v942_v63 = vpop.permute.xlu0 %941 }
 0x2d1   : > { %1526 = vmatpush.msk.msrb.mxu0 %vm837_vm3, %v942_v63  ;;  %v1323_v63 = vld [vmem:[%s2040_s6 + $0x68] sm:$0xff] }
 0x2d2   : > { %1527 = vmatmul.msk.f32.vlgmr.msrb.gmra.mxu0 %vm833_vm4, %v827_v62  ;;  %v1324_v62 = vld [vmem:[%s2040_s6 + $0x70] sm:$0xff] }
 0x2d3   : > { %v1023_v0 = vpop.permute.xlu1 %1022  ;;  %1067 = vmatpush.msra.mxu0 %v342_v9 }
 0x2d4   : > { %1532 = vmatpush.msk.msrb.mxu3 %vm837_vm3, %v1023_v0  ;;  %v1322_v0 = vld [vmem:[%s2040_s6 + $0x60] sm:$0xff] }
 0x2d5   : > { %1159 = vmatpush.msrb.mxu0 %v342_v9 }
 0x2d6   : > { %1136 = vmatpush.msra.mxu3 %v345_v8 }
 0x2ee   : > { %v808_v4 = vpop.xlane.xlu2 %807 }
 0x2fe   : > { %v814_v1 = vpop.xlane.xlu1 %813 }
 0x2ff   : > { %1609 = vrcp.f32 %v814_v1  ;;  %v1321_v1 = vld [vmem:[%s2040_s6 + $0x58] sm:$0xff] }
 0x300   : > { %1611 = vrcp.f32 %v808_v4 }
 0x305   : > { %v1610_v2 = vpop.eup %1609 }
 0x306   : > { %v830_v3 = vmul.f32 %v1610_v2, %v1596_v43  ;;  %v1612_v5 = vpop.eup %1611  ;;  %v1259_v43 = vld [vmem:[%s2039_s5 + $0x28] sm:$0xff]  ;;  %v1320_v2 = vld [vmem:[%s2040_s6 + $0x50] sm:$0xff] }
 0x307   : > { %v828_v6 = vmul.f32 %v1612_v5, %v1594_v41  ;;  %v1319_v5 = vld [vmem:[%s2040_s6 + $0x48] sm:$0xff] }
 0x308   : > { %1533 = vmatmul.msk.f32.vlgmr.msrb.gmra.mxu3 %vm833_vm4, %v830_v3 }
 0x309   : > { %1228 = vmatpush.msrb.mxu3 %v345_v8 }
 0x316   : > { %v969_v7 = vpop.permute.xlu1 %968 }
 0x317   : > { %1528 = vmatpush.msk.msrb.mxu1 %vm837_vm3, %v969_v7 }
 0x318   : > { %1529 = vmatmul.msk.f32.vlgmr.msrb.gmra.mxu1 %vm833_vm4, %v828_v6  ;;  %v1318_v6 = vld [vmem:[%s2040_s6 + $0x40] sm:$0xff] }
 0x319   : > { %1090 = vmatpush.msra.mxu1 %v343_v11 }
 0x31b   : > { %1182 = vmatpush.msrb.mxu1 %v343_v11 }
 0x33a   : > { %v938_v12 = vpop.f32.mrf.mxu3 }
 0x33b   : > { %1537 = vmatmul.msk.f32.vlgmr.msra.gmra.mxu3 %vm528_vm1, %v938_v12 }
 0x33c   : > { %1361 = vmatpush.msra.mxu3 %v1325_v61 }
 0x33e   : > { %1362 = vmatpush.msra.mxu3 %v1324_v62 }
 0x340   : > { %1363 = vmatpush.msra.mxu3 %v1323_v63 }
 0x342   : > { %v857_v13 = vpop.f32.mrf.mxu0  ;;  %v911_v14 = vpop.f32.mrf.mxu2  ;;  %1364 = vmatpush.msra.mxu3 %v1322_v0 }
 0x343   : > { %1534 = vmatmul.msk.f32.vlgmr.msra.gmra.mxu0 %vm528_vm1, %v857_v13  ;;  %1536 = vmatmul.msk.f32.vlgmr.msra.gmra.mxu2 %vm528_vm1, %v911_v14 }
 0x344   : > { %1277 = vmatpush.msra.mxu0 %v1257_v20  ;;  %1338 = vmatpush.msra.mxu2 %v1317_v36 }
 0x345   : > { %1365 = vmatpush.msra.mxu3 %v1321_v1 }
 0x346   : > { %1278 = vmatpush.msra.mxu0 %v1256_v21  ;;  %1339 = vmatpush.msra.mxu2 %v1316_v37 }
 0x347   : > { %1366 = vmatpush.msra.mxu3 %v1320_v2 }
 0x348   : > { %1279 = vmatpush.msra.mxu0 %v1255_v23  ;;  %1340 = vmatpush.msra.mxu2 %v1315_v44 }
 0x349   : > { %1367 = vmatpush.msra.mxu3 %v1319_v5 }
 0x34a   : > { %v884_v15 = vpop.f32.mrf.mxu1  ;;  %v1019_v16 = vpop.f32.mrf.mxu2  ;;  %1280 = vmatpush.msra.mxu0 %v1254_v24  ;;  %1341 = vmatpush.msra.mxu2 %v1314_v45 }
 0x34b   : > { %1535 = vmatmul.msk.f32.vlgmr.msra.gmra.mxu1 %vm528_vm1, %v884_v15  ;;  %1540 = vmatmul.msk.f32.vlgmr.msrb.gmra.mxu2 %vm528_vm1, %v1019_v16 }
 0x34c   : > { %1300 = vmatpush.msra.mxu1 %v1261_v22  ;;  %1342 = vmatpush.msra.mxu2 %v1313_v46 }
 0x34d   : > { %1368 = vmatpush.msra.mxu3 %v1318_v6 }
 0x34e   : > { %1301 = vmatpush.msra.mxu1 %v1260_v31  ;;  %1343 = vmatpush.msra.mxu2 %v1312_v47 }
 0x34f   : > { %v965_v17 = vpop.f32.mrf.mxu0 }
 0x350   : > { %1538 = vmatmul.msk.f32.vlgmr.msrb.gmra.mxu0 %vm528_vm1, %v965_v17  ;;  %1302 = vmatpush.msra.mxu1 %v1259_v43 }
 0x351   : > { %1344 = vmatpush.msra.mxu2 %v1311_v59 }
 0x352   : > { %1303 = vmatpush.msra.mxu1 %v1258_v28 }
 0x353   : > { %1345 = vmatpush.msra.mxu2 %v1310_v60 }
 0x38b   : > { %v1046_v18 = vpop.f32.mrf.mxu3 }
 0x38c   : > { %1541 = vmatmul.msk.f32.vlgmr.msrb.gmra.mxu3 %vm528_vm1, %v1046_v18 }
 0x395   : > { %v992_v19 = vpop.f32.mrf.mxu1 }
 0x396   : > { %1539 = vmatmul.msk.f32.vlgmr.msrb.gmra.mxu1 %vm528_vm1, %v992_v19 }
 0x3be   : > { %v1138_v32 = vpop.f32.mrf.mxu3 }
 0x3bf   : > { %v1239_v40 = vsel %vm1233_vm5, %v1138_v32, 0.0 }
 0x3c0   : > { %v1069_v25 = vpop.f32.mrf.mxu0 }
 0x3c1   : > { %v1234_v29 = vsel %vm1233_vm5, %v1069_v25, 0.0 }
 0x3c6   : > { %v1115_v26 = vpop.f32.mrf.mxu2 }
 0x3c7   : > { %v1237_v35 = vsel %vm1233_vm5, %v1115_v26, 0.0 }
 0x3c8   : > { %v1092_v27 = vpop.f32.mrf.mxu1 }
 0x3c9   : > { %v1235_v30 = vsel %vm1233_vm5, %v1092_v27, 0.0 }
 0x3ca   : > { %v1236_v34 = vadd.f32 %v1235_v30, %v1234_v29 }
 0x3cc   : > { %v1238_v38 = vadd.f32 %v1237_v35, %v1236_v34 }
 0x3cd   : > { %v1161_v48 = vpop.f32.mrf.mxu0 }
 0x3ce   : > { %v1240_v41 = vadd.f32 %v1239_v40, %v1238_v38  ;;  %v1207_v49 = vpop.f32.mrf.mxu2  ;;  %v1241_v51 = vsel %vm1233_vm5, %v1161_v48, 0.0 }
 0x3cf   : > { %v1244_v54 = vsel %vm1233_vm5, %v1207_v49, 0.0 }
 0x3d0   : > { %v1252_v42 = vadd.f32 %v1580_v33, %v1240_v41 }
 0x3d2   : > { %1542 = vmatmul.msk.f32.vlgmr.msra.gmra.mxu0 %vm358_vm0, %v1252_v42 }
 0x40f   : > { %v1230_v52 = vpop.f32.mrf.mxu3 }
 0x410   : > { %v1246_v56 = vsel %vm1233_vm5, %v1230_v52, 0.0 }
 0x413   : > { %v1184_v50 = vpop.f32.mrf.mxu1 }
 0x414   : > { %v1242_v39 = vsel %vm1233_vm5, %v1184_v50, 0.0 }
 0x415   : > { %v1243_v53 = vadd.f32 %v1242_v39, %v1241_v51 }
 0x417   : > { %v1245_v55 = vadd.f32 %v1244_v54, %v1243_v53 }
 0x419   : > { %v1247_v57 = vadd.f32 %v1246_v56, %v1245_v55 }
 0x41b   : > { %v1253_v58 = vadd.f32 %v1580_v33, %v1247_v57 }
 0x41d   : > { %1543 = vmatmul.msk.f32.vlgmr.msra.gmra.mxu1 %vm358_vm0, %v1253_v58 }
 0x44f   : > { %v1282_v3 = vpop.f32.mrf.mxu0 }
 0x450   : > { %v1308_v4 = vmax.f32 %v1282_v3, 0.0 }
 0x452   : > { %1544 = vmatmul.msk.f32.vlgmr.msra.gmra.mxu2 %vm1326_vm6, %v1308_v4 }
 0x49a   : > { %v1305_v7 = vpop.f32.mrf.mxu1 }
 0x49b   : > { %v1309_v8 = vmax.f32 %v1305_v7, 0.0 }
 0x49d   : > { %1545 = vmatmul.msk.f32.vlgmr.msra.gmra.mxu3 %vm1326_vm6, %v1309_v8 }
 0x4d5   : > { %v1347_v9 = vpop.f32.mrf.mxu2 }
 0x4d6   : > { %1373 = vst.msk [vmem:[%s319_s23] sm:$0xf] %vm1233_vm5, %v1347_v9 }
 0x4dd   : > { %v1400_v11 = vld [vmem:[%s319_s23] sm:$0xf] (%p1709_p5) }
 0x4de   : > { %1401 = vst [vmem:[%s1383_s12] sm:$0xf] (%p1709_p5), %v1400_v11 }
 0x51d   : > { %1381 = sbr.rel (!%p1709_p5) target bundleno = 1322 (0x52a), region = 93 }
 0x520   : > { %v1370_v10 = vpop.f32.mrf.mxu3 }
 0x521   : > { %1374 = vst.msk [vmem:[%s319_s23 + $0x4] sm:$0xf] %vm1233_vm5, %v1370_v10 }
 0x528   : > { %v1402_v12 = vld [vmem:[%s319_s23 + $0x4] sm:$0xf] }
 0x529   : > { %1403 = vst [vmem:[%s1383_s12 + $0x8] sm:$0xf] %v1402_v12 }
 0x52a PF: > { %p14_p10 = scmp.ge.s32.totalorder %s1696_s28, 4   ;;  %s2043_s24 = smov %s1631_s25 }
 0x52b   : > { %s2044_s25 = smov %s1707_s8  ;;  %s2045_s26 = smov %s1696_s28 }
 0x52c   :  { %16 = sbr.rel (!%p14_p10) target bundleno = 2 (0x2), region = 165 }

</bundles_post_ra>
